<compile_context>
chip_gen: v6e
topology: v6e:2x2x1
jax: 0.10.0
libtpu: 0.0.40
codegen_flags: <defaults>
</compile_context>

<pallas_src>
import math
import functools

import jax
import jax.numpy as jnp
from jax.experimental import pallas as pl
from jax.experimental.pallas import tpu as pltpu


_TWO_PI = 2.0 * math.pi


# ----------------------------------------------------------------------------
# Fused kernel
# ----------------------------------------------------------------------------
def _leaky_relu(h, slope=0.2):
    return jnp.where(h > 0, h, slope * h)


def fused_network_kernel(flag,
                         x_ref, bt_ref,
                         w0, b0, w1, b1, w2, b2, w3, b3, w4, b4,
                         *out_refs):
    """Encoding + 3 MLP branches + einsum, all in one kernel body.

    x_ref : [N, 3]               coordinates
    bt_ref: [1, posdim//2]       Gaussian-encoding matrix B^T (input_size=1)
    w*/b* : [3, in, out]/[3,1,out]  stacked (U, V, W) branch parameters
    out_refs (by flag):
      flag=1 -> ([1, N],)
      flag=2 -> ([N, N*N],)
      flag=3 -> ([N, N*N], [N, R], [N, R], [N, R])
    """
    bt = bt_ref[...]                                   # [1, posdim//2]

    uvw = []
    for i in range(3):                                 # unrolled: U, V, W branch
        xc = x_ref[:, i:i + 1]                         # [N, 1]
        vp = _TWO_PI * xc * bt                         # [N, posdim//2] (VPU bcast)
        coord = jnp.concatenate([jnp.cos(vp), jnp.sin(vp)], axis=-1)  # EUP

        h = _leaky_relu(
            jnp.dot(coord, w0[i], preferred_element_type=jnp.float32) + b0[i])
        h = _leaky_relu(
            jnp.dot(h, w1[i], preferred_element_type=jnp.float32) + b1[i])
        h = _leaky_relu(
            jnp.dot(h, w2[i], preferred_element_type=jnp.float32) + b2[i])
        h = _leaky_relu(
            jnp.dot(h, w3[i], preferred_element_type=jnp.float32) + b3[i])
        uvw.append(
            jnp.dot(h, w4[i], preferred_element_type=jnp.float32) + b4[i])

    U, V, W = uvw
    n, r = U.shape

    if flag == 1:
        # einsum('nr,nr,nr->n'); store lane-dense as [1, N].
        tri = jnp.sum(U * V * W, axis=-1, keepdims=True)        # [N, 1]
        out_refs[0][...] = tri.reshape(1, n)
    else:
        # einsum('ir,jr,kr->ijk'): out[i, j*N+k] = sum_r U[i,r] V[j,r] W[k,r]
        vw = (V[:, None, :] * W[None, :, :]).reshape(n * n, r)   # [N*N, R]
        out = jax.lax.dot_general(
            U, vw,
            dimension_numbers=(((1,), (1,)), ((), ())),
            preferred_element_type=jnp.float32)                  # [N, N*N] (MXU)
        out_refs[0][...] = out
        if flag == 3:
            out_refs[1][...] = U
            out_refs[2][...] = V
            out_refs[3][...] = W


# ----------------------------------------------------------------------------
# pallas_call wrapper (single block, whole arrays resident in VMEM)
# ----------------------------------------------------------------------------
def _vmem_spec():
    return pl.BlockSpec(memory_space=pltpu.MemorySpace.VMEM)


def network_forward(params, x, flag):
    n = x.shape[0]
    rank = params["w4"].shape[-1]

    inputs = (x, params["Bt"],
              params["w0"], params["b0"], params["w1"], params["b1"],
              params["w2"], params["b2"], params["w3"], params["b3"],
              params["w4"], params["b4"])
    in_specs = [_vmem_spec() for _ in inputs]

    if flag == 1:
        out_shape = jax.ShapeDtypeStruct((1, n), jnp.float32)
        out_specs = _vmem_spec()
    elif flag == 2:
        out_shape = jax.ShapeDtypeStruct((n, n * n), jnp.float32)
        out_specs = _vmem_spec()
    elif flag == 3:
        out_shape = (jax.ShapeDtypeStruct((n, n * n), jnp.float32),
                     jax.ShapeDtypeStruct((n, rank), jnp.float32),
                     jax.ShapeDtypeStruct((n, rank), jnp.float32),
                     jax.ShapeDtypeStruct((n, rank), jnp.float32))
        out_specs = (_vmem_spec(),) * 4
    else:
        raise NotImplementedError

    result = pl.pallas_call(
        functools.partial(fused_network_kernel, flag),
        out_shape=out_shape,
        in_specs=in_specs,
        out_specs=out_specs,
    )(*inputs)

    if flag == 1:
        return result[0]                     # [1, N] -> [N]
    elif flag == 2:
        return result.reshape(n, n, n)       # [N, N*N] -> [N, N, N]
    else:
        out, U, V, W = result
        return out.reshape(n, n, n), U, V, W


# ----------------------------------------------------------------------------
# Parameter initialization (deterministic, mirrors the PyTorch init schemes)
# ----------------------------------------------------------------------------
def init_params(key, rank, mid_channel, posdim):
    gain = math.sqrt(2.0 / (1.0 + 0.2 ** 2))   # calculate_gain('leaky_relu', 0.2)
    keys = iter(jax.random.split(key, 64))

    def linear(fan_in, fan_out, first=False, plain=False):
        kw, kb = next(keys), next(keys)
        if plain:                               # default nn.Linear init
            bound = 1.0 / math.sqrt(fan_in)
        elif first:                             # uniform(-1/in, 1/in)
            bound = 1.0 / fan_in
        else:                                   # xavier_uniform w/ gain
            bound = gain * math.sqrt(6.0 / (fan_in + fan_out))
        w = jax.random.uniform(kw, (fan_in, fan_out), jnp.float32, -bound, bound)
        b_bound = 1.0 / math.sqrt(fan_in)
        b = jax.random.uniform(kb, (1, fan_out), jnp.float32, -b_bound, b_bound)
        return w, b

    def branch():
        layers = [linear(posdim, mid_channel, first=True)]
        for _ in range(3):
            layers.append(linear(mid_channel, mid_channel))
        layers.append(linear(mid_channel, rank, plain=True))
        return layers

    branches = [branch() for _ in range(3)]     # U, V, W
    params = {}
    for li in range(5):
        params[f"w{li}"] = jnp.stack([branches[b][li][0] for b in range(3)])
        params[f"b{li}"] = jnp.stack([branches[b][li][1] for b in range(3)])

    # rff.layers.GaussianEncoding: b ~ N(0, sigma^2), shape [posdim//2, 1].
    B = 8.0 * jax.random.normal(next(keys), (posdim // 2, 1), jnp.float32)
    params["Bt"] = B.T                          # [1, posdim//2]
    return params


# ----------------------------------------------------------------------------
# Pure-JAX reference (correctness check only)
# ----------------------------------------------------------------------------
def _reference_forward(params, x, flag):
    def enc(xc):
        vp = _TWO_PI * xc * params["Bt"]
        return jnp.concatenate([jnp.cos(vp), jnp.sin(vp)], axis=-1)

    def mlp(c, i):
        h = c
        for li in range(4):
            h = h @ params[f"w{li}"][i] + params[f"b{li}"][i]
            h = jnp.where(h > 0, h, 0.2 * h)
        return h @ params["w4"][i] + params["b4"][i]

    U = mlp(enc(x[:, 0:1]), 0)
    V = mlp(enc(x[:, 1:2]), 1)
    W = mlp(enc(x[:, 2:3]), 2)
    if flag == 1:
        return jnp.einsum('nr,nr,nr->n', U, V, W)
    out = jnp.einsum('ir,jr,kr->ijk', U, V, W)
    if flag == 2:
        return out
    return out, U, V, W


# ----------------------------------------------------------------------------
if __name__ == "__main__":
    Rank, mid_channel, posdim = 8, 32, 16
    N = 8

    key = jax.random.PRNGKey(0)
    k_params, k_x = jax.random.split(key)
    params = init_params(k_params, Rank, mid_channel, posdim)
    x = jax.random.uniform(k_x, (N, 3), jnp.float32)   # [n_points, 3]

    out1 = network_forward(params, x, flag=1)          # [N]
    out2 = network_forward(params, x, flag=2)          # [N, N, N]
    out3, U, V, W = network_forward(params, x, flag=3)
    jax.block_until_ready((out1, out2, out3, U, V, W))

    assert out1.shape == (N,)
    assert out2.shape == (N, N, N)
    assert out3.shape == (N, N, N)
    assert U.shape == (N, Rank) and V.shape == (N, Rank) and W.shape == (N, Rank)

    # Numerical check against a pure-JAX reference.
    r1 = _reference_forward(params, x, 1)
    r3, rU, rV, rW = _reference_forward(params, x, 3)
    assert jnp.allclose(out1, r1, rtol=1e-3, atol=1e-3)
    assert jnp.allclose(out2, r3, rtol=1e-3, atol=1e-3)
    assert jnp.allclose(out3, r3, rtol=1e-3, atol=1e-3)
    assert jnp.allclose(U, rU, rtol=1e-3, atol=1e-3)
    assert jnp.allclose(V, rV, rtol=1e-3, atol=1e-3)
    assert jnp.allclose(W, rW, rtol=1e-3, atol=1e-3)

    print("KERNEL_OK")
</pallas_src>

<mosaic_0001>
module attributes {stable_mosaic.version = 11 : i64} {
  func.func @fused_network_kernel(%arg0: memref<8x3xf32, #tpu.memory_space<vmem>>, %arg1: memref<1x8xf32, #tpu.memory_space<vmem>>, %arg2: memref<3x16x32xf32, #tpu.memory_space<vmem>>, %arg3: memref<3x1x32xf32, #tpu.memory_space<vmem>>, %arg4: memref<3x32x32xf32, #tpu.memory_space<vmem>>, %arg5: memref<3x1x32xf32, #tpu.memory_space<vmem>>, %arg6: memref<3x32x32xf32, #tpu.memory_space<vmem>>, %arg7: memref<3x1x32xf32, #tpu.memory_space<vmem>>, %arg8: memref<3x32x32xf32, #tpu.memory_space<vmem>>, %arg9: memref<3x1x32xf32, #tpu.memory_space<vmem>>, %arg10: memref<3x32x8xf32, #tpu.memory_space<vmem>>, %arg11: memref<3x1x8xf32, #tpu.memory_space<vmem>>, %arg12: memref<1x8xf32, #tpu.memory_space<vmem>>) attributes {dimension_semantics = [], scalar_prefetch = 0 : i64, scratch_operands = 0 : i64, tpu.core_type = #tpu.core_type<tc>} {
    %c0 = arith.constant 0 : index
    %c0_0 = arith.constant 0 : index
    %0 = vector.load %arg1[%c0, %c0_0] : memref<1x8xf32, #tpu.memory_space<vmem>>, vector<1x8xf32>
    %c0_1 = arith.constant 0 : index
    %c0_2 = arith.constant 0 : index
    %1 = vector.load %arg0[%c0_1, %c0_2] : memref<8x3xf32, #tpu.memory_space<vmem>>, vector<8x1xf32>
    %cst = arith.constant 6.28318548 : f32
    %2 = vector.broadcast %cst : f32 to vector<8x1xf32>
    %3 = arith.mulf %2, %1 : vector<8x1xf32>
    %4 = vector.broadcast %3 : vector<8x1xf32> to vector<8x8xf32>
    %5 = vector.broadcast %0 : vector<1x8xf32> to vector<8x8xf32>
    %6 = arith.mulf %4, %5 : vector<8x8xf32>
    %7 = math.cos %6 : vector<8x8xf32>
    %8 = math.sin %6 : vector<8x8xf32>
    %9 = tpu.concatenate %7, %8 in 1 : vector<8x8xf32>, vector<8x8xf32> -> vector<8x16xf32>
    %c0_3 = arith.constant 0 : index
    %c0_4 = arith.constant 0 : index
    %c0_5 = arith.constant 0 : index
    %10 = vector.load %arg2[%c0_3, %c0_4, %c0_5] : memref<3x16x32xf32, #tpu.memory_space<vmem>>, vector<1x16x32xf32>
    %11 = vector.shape_cast %10 : vector<1x16x32xf32> to vector<16x32xf32>
    %cst_6 = arith.constant dense<0.000000e+00> : vector<8x32xf32>
    %12 = tpu.matmul %9, %11, %cst_6 {dimension_numbers = #tpu.dot_dimension_numbers<[1], [0], [0], [1], [0, 0, 1, 1], [], []>} : vector<8x16xf32>, vector<16x32xf32>, vector<8x32xf32> -> vector<8x32xf32>
    %c0_7 = arith.constant 0 : index
    %c0_8 = arith.constant 0 : index
    %c0_9 = arith.constant 0 : index
    %13 = vector.load %arg3[%c0_7, %c0_8, %c0_9] : memref<3x1x32xf32, #tpu.memory_space<vmem>>, vector<1x1x32xf32>
    %14 = vector.shape_cast %13 : vector<1x1x32xf32> to vector<1x32xf32>
    %15 = vector.broadcast %14 : vector<1x32xf32> to vector<8x32xf32>
    %16 = arith.addf %12, %15 : vector<8x32xf32>
    %cst_10 = arith.constant 0.000000e+00 : f32
    %17 = vector.broadcast %cst_10 : f32 to vector<8x32xf32>
    %18 = arith.cmpf ogt, %16, %17 : vector<8x32xf32>
    %cst_11 = arith.constant 2.000000e-01 : f32
    %19 = vector.broadcast %cst_11 : f32 to vector<8x32xf32>
    %20 = arith.mulf %19, %16 : vector<8x32xf32>
    %21 = arith.select %18, %16, %20 : vector<8x32xi1>, vector<8x32xf32>
    %c0_12 = arith.constant 0 : index
    %c0_13 = arith.constant 0 : index
    %c0_14 = arith.constant 0 : index
    %22 = vector.load %arg4[%c0_12, %c0_13, %c0_14] : memref<3x32x32xf32, #tpu.memory_space<vmem>>, vector<1x32x32xf32>
    %23 = vector.shape_cast %22 : vector<1x32x32xf32> to vector<32x32xf32>
    %cst_15 = arith.constant dense<0.000000e+00> : vector<8x32xf32>
    %24 = tpu.matmul %21, %23, %cst_15 {dimension_numbers = #tpu.dot_dimension_numbers<[1], [0], [0], [1], [0, 0, 1, 1], [], []>} : vector<8x32xf32>, vector<32x32xf32>, vector<8x32xf32> -> vector<8x32xf32>
    %c0_16 = arith.constant 0 : index
    %c0_17 = arith.constant 0 : index
    %c0_18 = arith.constant 0 : index
    %25 = vector.load %arg5[%c0_16, %c0_17, %c0_18] : memref<3x1x32xf32, #tpu.memory_space<vmem>>, vector<1x1x32xf32>
    %26 = vector.shape_cast %25 : vector<1x1x32xf32> to vector<1x32xf32>
    %27 = vector.broadcast %26 : vector<1x32xf32> to vector<8x32xf32>
    %28 = arith.addf %24, %27 : vector<8x32xf32>
    %cst_19 = arith.constant 0.000000e+00 : f32
    %29 = vector.broadcast %cst_19 : f32 to vector<8x32xf32>
    %30 = arith.cmpf ogt, %28, %29 : vector<8x32xf32>
    %cst_20 = arith.constant 2.000000e-01 : f32
    %31 = vector.broadcast %cst_20 : f32 to vector<8x32xf32>
    %32 = arith.mulf %31, %28 : vector<8x32xf32>
    %33 = arith.select %30, %28, %32 : vector<8x32xi1>, vector<8x32xf32>
    %c0_21 = arith.constant 0 : index
    %c0_22 = arith.constant 0 : index
    %c0_23 = arith.constant 0 : index
    %34 = vector.load %arg6[%c0_21, %c0_22, %c0_23] : memref<3x32x32xf32, #tpu.memory_space<vmem>>, vector<1x32x32xf32>
    %35 = vector.shape_cast %34 : vector<1x32x32xf32> to vector<32x32xf32>
    %cst_24 = arith.constant dense<0.000000e+00> : vector<8x32xf32>
    %36 = tpu.matmul %33, %35, %cst_24 {dimension_numbers = #tpu.dot_dimension_numbers<[1], [0], [0], [1], [0, 0, 1, 1], [], []>} : vector<8x32xf32>, vector<32x32xf32>, vector<8x32xf32> -> vector<8x32xf32>
    %c0_25 = arith.constant 0 : index
    %c0_26 = arith.constant 0 : index
    %c0_27 = arith.constant 0 : index
    %37 = vector.load %arg7[%c0_25, %c0_26, %c0_27] : memref<3x1x32xf32, #tpu.memory_space<vmem>>, vector<1x1x32xf32>
    %38 = vector.shape_cast %37 : vector<1x1x32xf32> to vector<1x32xf32>
    %39 = vector.broadcast %38 : vector<1x32xf32> to vector<8x32xf32>
    %40 = arith.addf %36, %39 : vector<8x32xf32>
    %cst_28 = arith.constant 0.000000e+00 : f32
    %41 = vector.broadcast %cst_28 : f32 to vector<8x32xf32>
    %42 = arith.cmpf ogt, %40, %41 : vector<8x32xf32>
    %cst_29 = arith.constant 2.000000e-01 : f32
    %43 = vector.broadcast %cst_29 : f32 to vector<8x32xf32>
    %44 = arith.mulf %43, %40 : vector<8x32xf32>
    %45 = arith.select %42, %40, %44 : vector<8x32xi1>, vector<8x32xf32>
    %c0_30 = arith.constant 0 : index
    %c0_31 = arith.constant 0 : index
    %c0_32 = arith.constant 0 : index
    %46 = vector.load %arg8[%c0_30, %c0_31, %c0_32] : memref<3x32x32xf32, #tpu.memory_space<vmem>>, vector<1x32x32xf32>
    %47 = vector.shape_cast %46 : vector<1x32x32xf32> to vector<32x32xf32>
    %cst_33 = arith.constant dense<0.000000e+00> : vector<8x32xf32>
    %48 = tpu.matmul %45, %47, %cst_33 {dimension_numbers = #tpu.dot_dimension_numbers<[1], [0], [0], [1], [0, 0, 1, 1], [], []>} : vector<8x32xf32>, vector<32x32xf32>, vector<8x32xf32> -> vector<8x32xf32>
    %c0_34 = arith.constant 0 : index
    %c0_35 = arith.constant 0 : index
    %c0_36 = arith.constant 0 : index
    %49 = vector.load %arg9[%c0_34, %c0_35, %c0_36] : memref<3x1x32xf32, #tpu.memory_space<vmem>>, vector<1x1x32xf32>
    %50 = vector.shape_cast %49 : vector<1x1x32xf32> to vector<1x32xf32>
    %51 = vector.broadcast %50 : vector<1x32xf32> to vector<8x32xf32>
    %52 = arith.addf %48, %51 : vector<8x32xf32>
    %cst_37 = arith.constant 0.000000e+00 : f32
    %53 = vector.broadcast %cst_37 : f32 to vector<8x32xf32>
    %54 = arith.cmpf ogt, %52, %53 : vector<8x32xf32>
    %cst_38 = arith.constant 2.000000e-01 : f32
    %55 = vector.broadcast %cst_38 : f32 to vector<8x32xf32>
    %56 = arith.mulf %55, %52 : vector<8x32xf32>
    %57 = arith.select %54, %52, %56 : vector<8x32xi1>, vector<8x32xf32>
    %c0_39 = arith.constant 0 : index
    %c0_40 = arith.constant 0 : index
    %c0_41 = arith.constant 0 : index
    %58 = vector.load %arg10[%c0_39, %c0_40, %c0_41] : memref<3x32x8xf32, #tpu.memory_space<vmem>>, vector<1x32x8xf32>
    %59 = vector.shape_cast %58 : vector<1x32x8xf32> to vector<32x8xf32>
    %cst_42 = arith.constant dense<0.000000e+00> : vector<8x8xf32>
    %60 = tpu.matmul %57, %59, %cst_42 {dimension_numbers = #tpu.dot_dimension_numbers<[1], [0], [0], [1], [0, 0, 1, 1], [], []>} : vector<8x32xf32>, vector<32x8xf32>, vector<8x8xf32> -> vector<8x8xf32>
    %c0_43 = arith.constant 0 : index
    %c0_44 = arith.constant 0 : index
    %c0_45 = arith.constant 0 : index
    %61 = vector.load %arg11[%c0_43, %c0_44, %c0_45] : memref<3x1x8xf32, #tpu.memory_space<vmem>>, vector<1x1x8xf32>
    %62 = vector.shape_cast %61 : vector<1x1x8xf32> to vector<1x8xf32>
    %63 = vector.broadcast %62 : vector<1x8xf32> to vector<8x8xf32>
    %64 = arith.addf %60, %63 : vector<8x8xf32>
    %c0_46 = arith.constant 0 : index
    %c1 = arith.constant 1 : index
    %65 = vector.load %arg0[%c0_46, %c1] : memref<8x3xf32, #tpu.memory_space<vmem>>, vector<8x1xf32>
    %cst_47 = arith.constant 6.28318548 : f32
    %66 = vector.broadcast %cst_47 : f32 to vector<8x1xf32>
    %67 = arith.mulf %66, %65 : vector<8x1xf32>
    %68 = vector.broadcast %67 : vector<8x1xf32> to vector<8x8xf32>
    %69 = vector.broadcast %0 : vector<1x8xf32> to vector<8x8xf32>
    %70 = arith.mulf %68, %69 : vector<8x8xf32>
    %71 = math.cos %70 : vector<8x8xf32>
    %72 = math.sin %70 : vector<8x8xf32>
    %73 = tpu.concatenate %71, %72 in 1 : vector<8x8xf32>, vector<8x8xf32> -> vector<8x16xf32>
    %c1_48 = arith.constant 1 : index
    %c0_49 = arith.constant 0 : index
    %c0_50 = arith.constant 0 : index
    %74 = vector.load %arg2[%c1_48, %c0_49, %c0_50] : memref<3x16x32xf32, #tpu.memory_space<vmem>>, vector<1x16x32xf32>
    %75 = vector.shape_cast %74 : vector<1x16x32xf32> to vector<16x32xf32>
    %cst_51 = arith.constant dense<0.000000e+00> : vector<8x32xf32>
    %76 = tpu.matmul %73, %75, %cst_51 {dimension_numbers = #tpu.dot_dimension_numbers<[1], [0], [0], [1], [0, 0, 1, 1], [], []>} : vector<8x16xf32>, vector<16x32xf32>, vector<8x32xf32> -> vector<8x32xf32>
    %c1_52 = arith.constant 1 : index
    %c0_53 = arith.constant 0 : index
    %c0_54 = arith.constant 0 : index
    %77 = vector.load %arg3[%c1_52, %c0_53, %c0_54] : memref<3x1x32xf32, #tpu.memory_space<vmem>>, vector<1x1x32xf32>
    %78 = vector.shape_cast %77 : vector<1x1x32xf32> to vector<1x32xf32>
    %79 = vector.broadcast %78 : vector<1x32xf32> to vector<8x32xf32>
    %80 = arith.addf %76, %79 : vector<8x32xf32>
    %cst_55 = arith.constant 0.000000e+00 : f32
    %81 = vector.broadcast %cst_55 : f32 to vector<8x32xf32>
    %82 = arith.cmpf ogt, %80, %81 : vector<8x32xf32>
    %cst_56 = arith.constant 2.000000e-01 : f32
    %83 = vector.broadcast %cst_56 : f32 to vector<8x32xf32>
    %84 = arith.mulf %83, %80 : vector<8x32xf32>
    %85 = arith.select %82, %80, %84 : vector<8x32xi1>, vector<8x32xf32>
    %c1_57 = arith.constant 1 : index
    %c0_58 = arith.constant 0 : index
    %c0_59 = arith.constant 0 : index
    %86 = vector.load %arg4[%c1_57, %c0_58, %c0_59] : memref<3x32x32xf32, #tpu.memory_space<vmem>>, vector<1x32x32xf32>
    %87 = vector.shape_cast %86 : vector<1x32x32xf32> to vector<32x32xf32>
    %cst_60 = arith.constant dense<0.000000e+00> : vector<8x32xf32>
    %88 = tpu.matmul %85, %87, %cst_60 {dimension_numbers = #tpu.dot_dimension_numbers<[1], [0], [0], [1], [0, 0, 1, 1], [], []>} : vector<8x32xf32>, vector<32x32xf32>, vector<8x32xf32> -> vector<8x32xf32>
    %c1_61 = arith.constant 1 : index
    %c0_62 = arith.constant 0 : index
    %c0_63 = arith.constant 0 : index
    %89 = vector.load %arg5[%c1_61, %c0_62, %c0_63] : memref<3x1x32xf32, #tpu.memory_space<vmem>>, vector<1x1x32xf32>
    %90 = vector.shape_cast %89 : vector<1x1x32xf32> to vector<1x32xf32>
    %91 = vector.broadcast %90 : vector<1x32xf32> to vector<8x32xf32>
    %92 = arith.addf %88, %91 : vector<8x32xf32>
    %cst_64 = arith.constant 0.000000e+00 : f32
    %93 = vector.broadcast %cst_64 : f32 to vector<8x32xf32>
    %94 = arith.cmpf ogt, %92, %93 : vector<8x32xf32>
    %cst_65 = arith.constant 2.000000e-01 : f32
    %95 = vector.broadcast %cst_65 : f32 to vector<8x32xf32>
    %96 = arith.mulf %95, %92 : vector<8x32xf32>
    %97 = arith.select %94, %92, %96 : vector<8x32xi1>, vector<8x32xf32>
    %c1_66 = arith.constant 1 : index
    %c0_67 = arith.constant 0 : index
    %c0_68 = arith.constant 0 : index
    %98 = vector.load %arg6[%c1_66, %c0_67, %c0_68] : memref<3x32x32xf32, #tpu.memory_space<vmem>>, vector<1x32x32xf32>
    %99 = vector.shape_cast %98 : vector<1x32x32xf32> to vector<32x32xf32>
    %cst_69 = arith.constant dense<0.000000e+00> : vector<8x32xf32>
    %100 = tpu.matmul %97, %99, %cst_69 {dimension_numbers = #tpu.dot_dimension_numbers<[1], [0], [0], [1], [0, 0, 1, 1], [], []>} : vector<8x32xf32>, vector<32x32xf32>, vector<8x32xf32> -> vector<8x32xf32>
    %c1_70 = arith.constant 1 : index
    %c0_71 = arith.constant 0 : index
    %c0_72 = arith.constant 0 : index
    %101 = vector.load %arg7[%c1_70, %c0_71, %c0_72] : memref<3x1x32xf32, #tpu.memory_space<vmem>>, vector<1x1x32xf32>
    %102 = vector.shape_cast %101 : vector<1x1x32xf32> to vector<1x32xf32>
    %103 = vector.broadcast %102 : vector<1x32xf32> to vector<8x32xf32>
    %104 = arith.addf %100, %103 : vector<8x32xf32>
    %cst_73 = arith.constant 0.000000e+00 : f32
    %105 = vector.broadcast %cst_73 : f32 to vector<8x32xf32>
    %106 = arith.cmpf ogt, %104, %105 : vector<8x32xf32>
    %cst_74 = arith.constant 2.000000e-01 : f32
    %107 = vector.broadcast %cst_74 : f32 to vector<8x32xf32>
    %108 = arith.mulf %107, %104 : vector<8x32xf32>
    %109 = arith.select %106, %104, %108 : vector<8x32xi1>, vector<8x32xf32>
    %c1_75 = arith.constant 1 : index
    %c0_76 = arith.constant 0 : index
    %c0_77 = arith.constant 0 : index
    %110 = vector.load %arg8[%c1_75, %c0_76, %c0_77] : memref<3x32x32xf32, #tpu.memory_space<vmem>>, vector<1x32x32xf32>
    %111 = vector.shape_cast %110 : vector<1x32x32xf32> to vector<32x32xf32>
    %cst_78 = arith.constant dense<0.000000e+00> : vector<8x32xf32>
    %112 = tpu.matmul %109, %111, %cst_78 {dimension_numbers = #tpu.dot_dimension_numbers<[1], [0], [0], [1], [0, 0, 1, 1], [], []>} : vector<8x32xf32>, vector<32x32xf32>, vector<8x32xf32> -> vector<8x32xf32>
    %c1_79 = arith.constant 1 : index
    %c0_80 = arith.constant 0 : index
    %c0_81 = arith.constant 0 : index
    %113 = vector.load %arg9[%c1_79, %c0_80, %c0_81] : memref<3x1x32xf32, #tpu.memory_space<vmem>>, vector<1x1x32xf32>
    %114 = vector.shape_cast %113 : vector<1x1x32xf32> to vector<1x32xf32>
    %115 = vector.broadcast %114 : vector<1x32xf32> to vector<8x32xf32>
    %116 = arith.addf %112, %115 : vector<8x32xf32>
    %cst_82 = arith.constant 0.000000e+00 : f32
    %117 = vector.broadcast %cst_82 : f32 to vector<8x32xf32>
    %118 = arith.cmpf ogt, %116, %117 : vector<8x32xf32>
    %cst_83 = arith.constant 2.000000e-01 : f32
    %119 = vector.broadcast %cst_83 : f32 to vector<8x32xf32>
    %120 = arith.mulf %119, %116 : vector<8x32xf32>
    %121 = arith.select %118, %116, %120 : vector<8x32xi1>, vector<8x32xf32>
    %c1_84 = arith.constant 1 : index
    %c0_85 = arith.constant 0 : index
    %c0_86 = arith.constant 0 : index
    %122 = vector.load %arg10[%c1_84, %c0_85, %c0_86] : memref<3x32x8xf32, #tpu.memory_space<vmem>>, vector<1x32x8xf32>
    %123 = vector.shape_cast %122 : vector<1x32x8xf32> to vector<32x8xf32>
    %cst_87 = arith.constant dense<0.000000e+00> : vector<8x8xf32>
    %124 = tpu.matmul %121, %123, %cst_87 {dimension_numbers = #tpu.dot_dimension_numbers<[1], [0], [0], [1], [0, 0, 1, 1], [], []>} : vector<8x32xf32>, vector<32x8xf32>, vector<8x8xf32> -> vector<8x8xf32>
    %c1_88 = arith.constant 1 : index
    %c0_89 = arith.constant 0 : index
    %c0_90 = arith.constant 0 : index
    %125 = vector.load %arg11[%c1_88, %c0_89, %c0_90] : memref<3x1x8xf32, #tpu.memory_space<vmem>>, vector<1x1x8xf32>
    %126 = vector.shape_cast %125 : vector<1x1x8xf32> to vector<1x8xf32>
    %127 = vector.broadcast %126 : vector<1x8xf32> to vector<8x8xf32>
    %128 = arith.addf %124, %127 : vector<8x8xf32>
    %c0_91 = arith.constant 0 : index
    %c2 = arith.constant 2 : index
    %129 = vector.load %arg0[%c0_91, %c2] : memref<8x3xf32, #tpu.memory_space<vmem>>, vector<8x1xf32>
    %cst_92 = arith.constant 6.28318548 : f32
    %130 = vector.broadcast %cst_92 : f32 to vector<8x1xf32>
    %131 = arith.mulf %130, %129 : vector<8x1xf32>
    %132 = vector.broadcast %131 : vector<8x1xf32> to vector<8x8xf32>
    %133 = vector.broadcast %0 : vector<1x8xf32> to vector<8x8xf32>
    %134 = arith.mulf %132, %133 : vector<8x8xf32>
    %135 = math.cos %134 : vector<8x8xf32>
    %136 = math.sin %134 : vector<8x8xf32>
    %137 = tpu.concatenate %135, %136 in 1 : vector<8x8xf32>, vector<8x8xf32> -> vector<8x16xf32>
    %c2_93 = arith.constant 2 : index
    %c0_94 = arith.constant 0 : index
    %c0_95 = arith.constant 0 : index
    %138 = vector.load %arg2[%c2_93, %c0_94, %c0_95] : memref<3x16x32xf32, #tpu.memory_space<vmem>>, vector<1x16x32xf32>
    %139 = vector.shape_cast %138 : vector<1x16x32xf32> to vector<16x32xf32>
    %cst_96 = arith.constant dense<0.000000e+00> : vector<8x32xf32>
    %140 = tpu.matmul %137, %139, %cst_96 {dimension_numbers = #tpu.dot_dimension_numbers<[1], [0], [0], [1], [0, 0, 1, 1], [], []>} : vector<8x16xf32>, vector<16x32xf32>, vector<8x32xf32> -> vector<8x32xf32>
    %c2_97 = arith.constant 2 : index
    %c0_98 = arith.constant 0 : index
    %c0_99 = arith.constant 0 : index
    %141 = vector.load %arg3[%c2_97, %c0_98, %c0_99] : memref<3x1x32xf32, #tpu.memory_space<vmem>>, vector<1x1x32xf32>
    %142 = vector.shape_cast %141 : vector<1x1x32xf32> to vector<1x32xf32>
    %143 = vector.broadcast %142 : vector<1x32xf32> to vector<8x32xf32>
    %144 = arith.addf %140, %143 : vector<8x32xf32>
    %cst_100 = arith.constant 0.000000e+00 : f32
    %145 = vector.broadcast %cst_100 : f32 to vector<8x32xf32>
    %146 = arith.cmpf ogt, %144, %145 : vector<8x32xf32>
    %cst_101 = arith.constant 2.000000e-01 : f32
    %147 = vector.broadcast %cst_101 : f32 to vector<8x32xf32>
    %148 = arith.mulf %147, %144 : vector<8x32xf32>
    %149 = arith.select %146, %144, %148 : vector<8x32xi1>, vector<8x32xf32>
    %c2_102 = arith.constant 2 : index
    %c0_103 = arith.constant 0 : index
    %c0_104 = arith.constant 0 : index
    %150 = vector.load %arg4[%c2_102, %c0_103, %c0_104] : memref<3x32x32xf32, #tpu.memory_space<vmem>>, vector<1x32x32xf32>
    %151 = vector.shape_cast %150 : vector<1x32x32xf32> to vector<32x32xf32>
    %cst_105 = arith.constant dense<0.000000e+00> : vector<8x32xf32>
    %152 = tpu.matmul %149, %151, %cst_105 {dimension_numbers = #tpu.dot_dimension_numbers<[1], [0], [0], [1], [0, 0, 1, 1], [], []>} : vector<8x32xf32>, vector<32x32xf32>, vector<8x32xf32> -> vector<8x32xf32>
    %c2_106 = arith.constant 2 : index
    %c0_107 = arith.constant 0 : index
    %c0_108 = arith.constant 0 : index
    %153 = vector.load %arg5[%c2_106, %c0_107, %c0_108] : memref<3x1x32xf32, #tpu.memory_space<vmem>>, vector<1x1x32xf32>
    %154 = vector.shape_cast %153 : vector<1x1x32xf32> to vector<1x32xf32>
    %155 = vector.broadcast %154 : vector<1x32xf32> to vector<8x32xf32>
    %156 = arith.addf %152, %155 : vector<8x32xf32>
    %cst_109 = arith.constant 0.000000e+00 : f32
    %157 = vector.broadcast %cst_109 : f32 to vector<8x32xf32>
    %158 = arith.cmpf ogt, %156, %157 : vector<8x32xf32>
    %cst_110 = arith.constant 2.000000e-01 : f32
    %159 = vector.broadcast %cst_110 : f32 to vector<8x32xf32>
    %160 = arith.mulf %159, %156 : vector<8x32xf32>
    %161 = arith.select %158, %156, %160 : vector<8x32xi1>, vector<8x32xf32>
    %c2_111 = arith.constant 2 : index
    %c0_112 = arith.constant 0 : index
    %c0_113 = arith.constant 0 : index
    %162 = vector.load %arg6[%c2_111, %c0_112, %c0_113] : memref<3x32x32xf32, #tpu.memory_space<vmem>>, vector<1x32x32xf32>
    %163 = vector.shape_cast %162 : vector<1x32x32xf32> to vector<32x32xf32>
    %cst_114 = arith.constant dense<0.000000e+00> : vector<8x32xf32>
    %164 = tpu.matmul %161, %163, %cst_114 {dimension_numbers = #tpu.dot_dimension_numbers<[1], [0], [0], [1], [0, 0, 1, 1], [], []>} : vector<8x32xf32>, vector<32x32xf32>, vector<8x32xf32> -> vector<8x32xf32>
    %c2_115 = arith.constant 2 : index
    %c0_116 = arith.constant 0 : index
    %c0_117 = arith.constant 0 : index
    %165 = vector.load %arg7[%c2_115, %c0_116, %c0_117] : memref<3x1x32xf32, #tpu.memory_space<vmem>>, vector<1x1x32xf32>
    %166 = vector.shape_cast %165 : vector<1x1x32xf32> to vector<1x32xf32>
    %167 = vector.broadcast %166 : vector<1x32xf32> to vector<8x32xf32>
    %168 = arith.addf %164, %167 : vector<8x32xf32>
    %cst_118 = arith.constant 0.000000e+00 : f32
    %169 = vector.broadcast %cst_118 : f32 to vector<8x32xf32>
    %170 = arith.cmpf ogt, %168, %169 : vector<8x32xf32>
    %cst_119 = arith.constant 2.000000e-01 : f32
    %171 = vector.broadcast %cst_119 : f32 to vector<8x32xf32>
    %172 = arith.mulf %171, %168 : vector<8x32xf32>
    %173 = arith.select %170, %168, %172 : vector<8x32xi1>, vector<8x32xf32>
    %c2_120 = arith.constant 2 : index
    %c0_121 = arith.constant 0 : index
    %c0_122 = arith.constant 0 : index
    %174 = vector.load %arg8[%c2_120, %c0_121, %c0_122] : memref<3x32x32xf32, #tpu.memory_space<vmem>>, vector<1x32x32xf32>
    %175 = vector.shape_cast %174 : vector<1x32x32xf32> to vector<32x32xf32>
    %cst_123 = arith.constant dense<0.000000e+00> : vector<8x32xf32>
    %176 = tpu.matmul %173, %175, %cst_123 {dimension_numbers = #tpu.dot_dimension_numbers<[1], [0], [0], [1], [0, 0, 1, 1], [], []>} : vector<8x32xf32>, vector<32x32xf32>, vector<8x32xf32> -> vector<8x32xf32>
    %c2_124 = arith.constant 2 : index
    %c0_125 = arith.constant 0 : index
    %c0_126 = arith.constant 0 : index
    %177 = vector.load %arg9[%c2_124, %c0_125, %c0_126] : memref<3x1x32xf32, #tpu.memory_space<vmem>>, vector<1x1x32xf32>
    %178 = vector.shape_cast %177 : vector<1x1x32xf32> to vector<1x32xf32>
    %179 = vector.broadcast %178 : vector<1x32xf32> to vector<8x32xf32>
    %180 = arith.addf %176, %179 : vector<8x32xf32>
    %cst_127 = arith.constant 0.000000e+00 : f32
    %181 = vector.broadcast %cst_127 : f32 to vector<8x32xf32>
    %182 = arith.cmpf ogt, %180, %181 : vector<8x32xf32>
    %cst_128 = arith.constant 2.000000e-01 : f32
    %183 = vector.broadcast %cst_128 : f32 to vector<8x32xf32>
    %184 = arith.mulf %183, %180 : vector<8x32xf32>
    %185 = arith.select %182, %180, %184 : vector<8x32xi1>, vector<8x32xf32>
    %c2_129 = arith.constant 2 : index
    %c0_130 = arith.constant 0 : index
    %c0_131 = arith.constant 0 : index
    %186 = vector.load %arg10[%c2_129, %c0_130, %c0_131] : memref<3x32x8xf32, #tpu.memory_space<vmem>>, vector<1x32x8xf32>
    %187 = vector.shape_cast %186 : vector<1x32x8xf32> to vector<32x8xf32>
    %cst_132 = arith.constant dense<0.000000e+00> : vector<8x8xf32>
    %188 = tpu.matmul %185, %187, %cst_132 {dimension_numbers = #tpu.dot_dimension_numbers<[1], [0], [0], [1], [0, 0, 1, 1], [], []>} : vector<8x32xf32>, vector<32x8xf32>, vector<8x8xf32> -> vector<8x8xf32>
    %c2_133 = arith.constant 2 : index
    %c0_134 = arith.constant 0 : index
    %c0_135 = arith.constant 0 : index
    %189 = vector.load %arg11[%c2_133, %c0_134, %c0_135] : memref<3x1x8xf32, #tpu.memory_space<vmem>>, vector<1x1x8xf32>
    %190 = vector.shape_cast %189 : vector<1x1x8xf32> to vector<1x8xf32>
    %191 = vector.broadcast %190 : vector<1x8xf32> to vector<8x8xf32>
    %192 = arith.addf %188, %191 : vector<8x8xf32>
    %193 = arith.mulf %64, %128 : vector<8x8xf32>
    %194 = arith.mulf %193, %192 : vector<8x8xf32>
    %cst_136 = arith.constant dense<0.000000e+00> : vector<8xf32>
    %195 = vector.multi_reduction <add>, %194, %cst_136 [1] : vector<8x8xf32> to vector<8xf32>
    %196 = vector.shape_cast %195 : vector<8xf32> to vector<8x1xf32>
    %197 = vector.shape_cast %196 : vector<8x1xf32> to vector<1x8xf32>
    %c0_137 = arith.constant 0 : index
    %c0_138 = arith.constant 0 : index
    %198 = vector.load %arg12[%c0_137, %c0_138] : memref<1x8xf32, #tpu.memory_space<vmem>>, vector<1x8xf32>
    tpu.vector_store %arg12[%c0_137, %c0_138], %197 {strides = array<i32>} : memref<1x8xf32, #tpu.memory_space<vmem>>, vector<1x8xf32>,
    return
  }
}

</mosaic_0001>

<bundles_post_ra>
// kernel: tpu_custom_call.1
= control target key start
LH: loop header
LB: loop body
LE: loop exit
PB: predicated region body
PF: predicated region fallthrough
CT: control target
= control target key end

     0   :  { %17 = vsyncpa [#allocation3], 0  ;;  %s2962_s0 = inlined_call_operand.vmem [shape: f32[8,3], index: 0, kind: input, shape index: {}]   ;;  %s2963_s1 = inlined_call_operand.vmem [shape: f32[1,8], index: 1, kind: input, shape index: {}]   ;;  %s2964_s2 = inlined_call_operand.hbm [shape: f32[3,16,32], index: 2, kind: input, shape index: {}]   ;;  %s2965_s3 = inlined_call_operand.vmem [shape: f32[3,1,32], index: 3, kind: input, shape index: {}]   ;;  %s2966_s4 = inlined_call_operand.vmem [shape: f32[3,32,32], index: 4, kind: input, shape index: {}]   ;;  %s2967_s5 = inlined_call_operand.vmem [shape: f32[3,1,32], index: 5, kind: input, shape index: {}]   ;;  %s2968_s6 = inlined_call_operand.hbm [shape: f32[3,32,32], index: 6, kind: input, shape index: {}]   ;;  %s2969_s7 = inlined_call_operand.vmem [shape: f32[3,1,32], index: 7, kind: input, shape index: {}]   ;;  %s2970_s8 = inlined_call_operand.hbm [shape: f32[3,32,32], index: 8, kind: input, shape index: {}]   ;;  %s2971_s9 = inlined_call_operand.vmem [shape: f32[3,1,32], index: 9, kind: input, shape index: {}]   ;;  %s2972_s10 = inlined_call_operand.vmem [shape: f32[3,32,8], index: 10, kind: input, shape index: {}]   ;;  %s2973_s11 = inlined_call_operand.vmem [shape: f32[3,1,8], index: 11, kind: input, shape index: {}]   ;;  %s2974_s12 = inlined_call_operand.hbm [shape: f32[1,8], index: 12, kind: output, shape index: {}]  }
   0x1   :  { %18 = vsyncpa [#allocation6], 0 }
   0x2   :  { %19 = vsyncpa [#allocation4], 0  ;;  %s2521_s21 = smov [#allocation5]   ;;  %s2522_s23 = smov [#allocation2]  }
   0x3   :  { %s47_s22 = sshll.u32 %s2521_s21, 4  ;;  %s29_s24 = sshll.u32 %s2522_s23, 4  ;;  %s48_s22 = int_to_ptr.vmem [resolvable:$true] %s47_s22  ;;  %s30_s24 = int_to_ptr.vmem [resolvable:$true] %s29_s24 }
   0x4   :  { %s2443_s25 = scalar_lea.vmem %s48_s22, 1536  ;;  %p2448_p1 = scmp.lt.s32.totalorder %s48_s22, %s48_s22 }
   0x5   :  { %p2444_p0 = scmp.ne.s32.totalorder %s48_s22, %s2443_s25  ;;  %p2449_p2 = scmp.lt.s32.totalorder %s2443_s25, %s2443_s25 }
   0x7   :  { %p2450_p3 = por %p2449_p2, %p2448_p1 }
   0x9   :  { %p2451_p4 = pnand %p2450_p3, %p2444_p0 }
   0xb   :  { %2454 = shalt.err (!%p2451_p4)
}
   0xc   :  { %s2523_s26 = smov 128   ;;  %s2524_s27 = smov 8  }
   0xd   :  { %53 = dma.hbm_to_vmem [thread:$0]  %s2968_s6, 1536, %s48_s22, [#allocation6], %s2523_s26, %s2523_s26, %s2524_s27  }
   0xe   :  { %s2463_s30 = scalar_lea.vmem %s30_s24, 768  ;;  %p2468_p6 = scmp.lt.s32.totalorder %s30_s24, %s30_s24 }
   0xf   :  { %p2464_p5 = scmp.ne.s32.totalorder %s30_s24, %s2463_s30  ;;  %p2469_p7 = scmp.lt.s32.totalorder %s2463_s30, %s2463_s30 }
  0x11   :  { %p2470_p8 = por %p2469_p7, %p2468_p6 }
  0x13   :  { %p2471_p9 = pnand %p2470_p8, %p2464_p5 }
  0x15   :  { %2474 = shalt.err (!%p2471_p9)
}
  0x16   :  { %35 = dma.hbm_to_vmem [thread:$0]  %s2964_s2, 768, %s30_s24, [#allocation3], %s2523_s26, %s2523_s26, %s2524_s27  }
  0x17   :  { %s2525_s15 = smov [#allocation7]  }
  0x18   :  { %s61_s16 = sshll.u32 %s2525_s15, 4  ;;  %s62_s16 = int_to_ptr.vmem [resolvable:$true] %s61_s16 }
  0x19   :  { %s2483_s17 = scalar_lea.vmem %s62_s16, 1536  ;;  %p2488_p11 = scmp.lt.s32.totalorder %s62_s16, %s62_s16 }
  0x1a   :  { %p2484_p10 = scmp.ne.s32.totalorder %s62_s16, %s2483_s17  ;;  %p2489_p12 = scmp.lt.s32.totalorder %s2483_s17, %s2483_s17 }
  0x1c   :  { %p2490_p13 = por %p2489_p12, %p2488_p11 }
  0x1e   :  { %p2491_p0 = pnand %p2490_p13, %p2484_p10 }
  0x20   :  { %2494 = shalt.err (!%p2491_p0)
}
  0x21   :  { %67 = dma.hbm_to_vmem [thread:$0]  %s2970_s8, 1536, %s62_s16, [#allocation6], %s2523_s26, %s2523_s26, %s2524_s27  }
  0x22   :  { %2515 = dma.done.wait [#allocation3], 768  }
  0x23   :  { %2516 = vsyncadd [#allocation3], 4294966528 }
  0x24   :  { %2517 = dma.done.wait [#allocation6], 3072  }
  0x25   :  { %2518 = vsyncadd [#allocation6], 4294964224  ;;  %v2526_v0 = vmov 0   ;;  %v84_v1 = vld [vmem:[%s2962_s0] sm:$0xff]  ;;  %v312_v3 = vld [vmem:[#allocation2 + $0x8] sm:$0xff]  ;;  %v2527_v4 = vmov 0.0  }
  0x26   :  { %2420 = vset.pattern.permute.xlu0 %v2526_v0  ;;  %v2618_v2 = vmul.f32 6.2831855, %v84_v1  ;;  %2238 = vmatprep.subr.mxu0 %v2527_v4  ;;  %v2627_v5 = vld [vmem:[%s2963_s1] ss:$0 sm:$0xff]  ;;  %v2528_v19 = vmov 2102212464  }
  0x27   :  { %2245 = vmatprep.subr.mxu1 %v2527_v4  ;;  %2239 = vmatpush3.msra.mxu0 %v312_v3  ;;  %v2529_v21 = vmov 920167782   ;;  %v2530_v25 = vmov 1326507024   ;;  %v2531_v27 = vmov 683565275  }
  0x28   :  { %88 = vperm.xlu0 %2420, %v2618_v2   ;;  %2240 = vmatprep.subr.mxu0 %v2527_v4  ;;  %v2532_v29 = vmov 2475754826   ;;  %v2533_v32 = vmov 2131351028   ;;  %vm2534_vm9 = vmmov 0  }
  0x29   :  { %2242 = vmatprep.mubr.msk.f32.mxu0 %vm2534_vm9, %v2527_v4  ;;  %2253 = vmatprep.mubr.msk.f32.mxu1 %vm2534_vm9, %v2527_v4 }
  0xa3   :  { %v89_v6 = vpop.permute.xlu0 %88 }
  0xa4   :  { %v2630_v7 = vmul.f32 %v2627_v5, %v89_v6 }
  0xa6   :  { %v101_v8 = vand.u32 2139095040, %v2630_v7  ;;  %v98_v9 = vand.u32 2147483647, %v2630_v7  ;;  %vm100_vm7 = vcmp.lt.s32.totalorder %v2630_v7, 0 }
  0xa8   :  { %v102_v10 = vshrl.u32 %v101_v8, 23  ;;  %v105_v12 = vand.u32 8388607, %v98_v9  ;;  %vm99_vm8 = vcmp.le.f32.partialorder %v98_v9, 0.7853982 }
  0xaa   :  { %v2089_v11 = vadd.s32 4294967169, %v102_v10  ;;  %v106_v15 = vor.u32 8388608, %v105_v12 }
  0xac   :  { %v108_v13 = vadd.s32 1, %v2089_v11  ;;  %v146_v23 = vshll.u32 %v106_v15, 8 }
  0xae   :  { %vm109_vm0 = vcmp.gt.s32.totalorder %v108_v13, 0 }
  0xaf   :  { %v110_v14 = vsel %vm109_vm0, %v108_v13, 0  ;;  %vm190_vm0 = vweird.f32 %v2630_v7 }
  0xb0   :  { %v112_v16 = vand.u32 31, %v110_v14  ;;  %v111_v17 = vshrl.u32 %v110_v14, 5 }
  0xb2   :  { %v113_v18 = vsub.s32 32, %v112_v16  ;;  %v124_v20 = vshll.u32 %v2528_v19, %v112_v16  ;;  %v127_v22 = vshll.u32 %v2529_v21, %v112_v16  ;;  %v115_v28 = vshll.u32 %v2531_v27, %v112_v16 }
  0xb3   :  { %v118_v31 = vshll.u32 %v2532_v29, %v112_v16  ;;  %v121_v34 = vshll.u32 %v2533_v32, %v112_v16  ;;  %vm133_vm1 = vcmp.lt.s32.totalorder %v111_v17, 4  ;;  %vm130_vm2 = vcmp.lt.s32.totalorder %v111_v17, 1 }
  0xb4   :  { %v125_v24 = vshrl.u32 %v2529_v21, %v113_v18  ;;  %v128_v26 = vshrl.u32 %v2530_v25, %v113_v18  ;;  %v116_v30 = vshrl.u32 %v2532_v29, %v113_v18  ;;  %v119_v33 = vshrl.u32 %v2533_v32, %v113_v18 }
  0xb5   :  { %v122_v35 = vshrl.u32 %v2528_v19, %v113_v18  ;;  %v114_v39 = vshrl.u32 %v2531_v27, %v113_v18  ;;  %vm131_vm3 = vcmp.lt.s32.totalorder %v111_v17, 2  ;;  %vm132_vm4 = vcmp.lt.s32.totalorder %v111_v17, 3 }
  0xb6   :  { %v126_v36 = vor.u32 %v125_v24, %v124_v20  ;;  %v129_v37 = vor.u32 %v128_v26, %v127_v22  ;;  %v117_v38 = vor.u32 %v116_v30, %v115_v28  ;;  %v120_v40 = vor.u32 %v119_v33, %v118_v31 }
  0xb7   :  { %v123_v41 = vor.u32 %v122_v35, %v121_v34 }
  0xb8   :  { %v139_v42 = vsel %vm133_vm1, %v126_v36, 920167782  ;;  %v143_v43 = vsel %vm133_vm1, %v129_v37, 1326507024  ;;  %v138_v45 = vsel %vm130_vm2, %v117_v38, %v120_v40  ;;  %v134_v48 = vsel %vm130_vm2, %v114_v39, %v117_v38  ;;  %v311_v37 = vld [vmem:[#allocation2] sm:$0xff]  ;;  %v400_v38 = vld [vmem:[%s2966_s4 + $0x18] sm:$0xff] }
  0xb9   :  { %v135_v44 = vsel %vm133_vm1, %v123_v41, 2102212464  ;;  %v140_v46 = vsel %vm132_vm4, %v123_v41, %v139_v42  ;;  %v142_v47 = vsel %vm130_vm2, %v120_v40, %v123_v41  ;;  %v144_v51 = vsel %vm132_vm4, %v126_v36, %v143_v43  ;;  %2241 = vmatpush3.msra.mxu0 %v311_v37  ;;  %2246 = vmatpush3.msra.mxu1 %v400_v38 }
  0xba   :  { %v136_v49 = vsel %vm132_vm4, %v120_v40, %v135_v44  ;;  %v141_v50 = vsel %vm131_vm3, %v138_v45, %v140_v46  ;;  %v145_v52 = vsel %vm131_vm3, %v142_v47, %v144_v51  ;;  %v2535_v39 = vmov 1   ;;  %2247 = vmatprep.subr.mxu1 %v2527_v4  ;;  %2256 = vmatprep.subr.mxu0 %v2527_v4 }
  0xbb   :  { %v2647_v53 = vmul.u32.u64.low %v146_v23, %v141_v50  ;;  %v2648_v54 = vmul.u32.u64.high %v146_v23, %v141_v50, %v2647_v53  ;;  %v2650_v55 = vmul.u32.u64.low %v146_v23, %v145_v52  ;;  %v2651_v56 = vmul.u32.u64.high %v146_v23, %v145_v52, %v2650_v55  ;;  %2421 = vset.pattern.permute.xlu1 %v2535_v39 }
  0xbc   :  { %v137_v57 = vsel %vm131_vm3, %v134_v48, %v136_v49  ;;  %744 = vperm.xlu1 %2421, %v2618_v2   ;;  %vm309_vm1 = vcmask 64512   ;;  %vm320_vm2 = vcmask 130048   ;;  %v398_v55 = vld [vmem:[%s2966_s4 + $0x8] sm:$0xff] }
  0xbd   :  { %v156_v58 = vadd.s32 1, %v2648_v54  ;;  %v153_v59 = vmul.u32 %v146_v23, %v137_v57  ;;  %vm155_vm5 = vc.u32 %v2651_v56, %v2647_v53  ;;  %v154_v12 = vadd.s32 %v2647_v53, %v2651_v56  ;;  %v397_v56 = vld [vmem:[%s2966_s4] sm:$0xff] }
  0xbf   :  { %v157_v60 = vsel %vm155_vm5, %v156_v58, %v2648_v54  ;;  %v488_v58 = vld [vmem:[#allocation5 + $0x18] sm:$0xff] }
  0xc0   :  { %v158_v61 = vadd.s32 %v157_v60, %v153_v59 }
  0xc2   :  { %v159_v62 = vadd.s32 536870912, %v158_v61 }
  0xc4   :  { %v160_v63 = vshrl.u32 %v159_v62, 30 }
  0xc6   :  { %v161_v0 = vshll.u32 %v160_v63, 30  ;;  %v184_v30 = vsub.s32 4, %v160_v63 }
  0xc8   :  { %v162_v1 = vsub.s32 %v158_v61, %v161_v0  ;;  %v185_v34 = vsel %vm100_vm7, %v184_v30, %v160_v63 }
  0xc9   :  { %v187_v35 = vsel %vm99_vm8, 0, %v185_v34 }
  0xca   :  { %v164_v3 = vsub.s32 0, %v162_v1  ;;  %v294_v36 = vadd.s32 3, %v187_v35  ;;  %v191_v9 = vand.u32 3, %v187_v35 }
  0xcc   :  { %v2090_v6 = vmin.u32 %v164_v3, %v162_v1  ;;  %v295_v40 = vand.u32 3, %v294_v36  ;;  %vm196_vm10 = vcmp.eq.s32.totalorder %v191_v9, 2  ;;  %vm193_vm12 = vcmp.eq.s32.totalorder %v191_v9, 0 }
  0xcd   :  { %vm192_vm14 = vcmp.lt.s32.totalorder %v191_v9, 2 }
  0xce   :  { %v166_v8 = vclz %v2090_v6  ;;  %vm300_vm11 = vcmp.eq.s32.totalorder %v295_v40, 2  ;;  %vm297_vm13 = vcmp.eq.s32.totalorder %v295_v40, 0  ;;  %vm296_vm15 = vcmp.lt.s32.totalorder %v295_v40, 2 }
  0xd0   :  { %v2091_v10 = vadd.s32 4294967294, %v166_v8 }
  0xd2   :  { %vm2092_vm6 = vcmp.lt.s32.totalorder %v2091_v10, 0 }
  0xd3   :  { %v169_v11 = vsel %vm2092_vm6, 0, %v2091_v10 }
  0xd4   :  { %v170_v13 = vsub.s32 32, %v169_v11  ;;  %v174_v14 = vsub.s32 4294967266, %v169_v11  ;;  %v171_v15 = vshll.u32 %v162_v1, %v169_v11 }
  0xd6   :  { %v172_v16 = vshrl.u32 %v154_v12, %v170_v13  ;;  %v175_v17 = vadd.s32 127, %v174_v14 }
  0xd8   :  { %v173_v18 = vor.u32 %v172_v16, %v171_v15  ;;  %v176_v20 = vshll.u32 %v175_v17, 23 }
  0xda   :  { %v177_v22 = vor.u32 4788187, %v176_v20  ;;  %v180_v24 = vcvt.s32.f32 %v173_v18 }
  0xdc   :  { %v178_v23 = vand.u32 2147483647, %v177_v22 }
  0xde   :  { %v181_v26 = vmul.f32 %v180_v24, %v178_v23 }
  0xe0   :  { %v182_v28 = vxor.u32 2147483648, %v181_v26 }
  0xe2   :  { %v183_v31 = vsel %vm100_vm7, %v182_v28, %v181_v26 }
  0xe3   :  { %v186_v33 = vsel %vm99_vm8, %v2630_v7, %v183_v31  ;;  %v399_v7 = vld [vmem:[%s2966_s4 + $0x10] sm:$0xff] }
  0xe4   :  { %2423 = vcosq.f32 %v186_v33  ;;  %2248 = vmatpush3.msra.mxu1 %v399_v7 }
  0xe5   :  { %2425 = vsinq.f32 %v186_v33  ;;  %2249 = vmatprep.subr.mxu1 %v2527_v4 }
  0xe6   :  { %2250 = vmatpush3.msra.mxu1 %v398_v55 }
  0xe7   :  { %2251 = vmatprep.subr.mxu1 %v2527_v4 }
  0xe8   :  { %2252 = vmatpush3.msra.mxu1 %v397_v56 }
  0xe9   :  { %2267 = vmatprep.subr.mxu1 %v2527_v4 }
  0xf1   :  { %v2424_v41 = vpop.eup %2423 }
  0xf2   :  { %v2426_v42 = vpop.eup %2425  ;;  %v197_v43 = vxor.u32 2147483648, %v2424_v41 }
  0xf3   :  { %v194_v44 = vxor.u32 2147483648, %v2426_v42 }
  0xf4   :  { %v302_v45 = vsel %vm300_vm11, %v197_v43, %v2426_v42  ;;  %v198_v46 = vsel %vm196_vm10, %v197_v43, %v2426_v42 }
  0xf5   :  { %v299_v47 = vsel %vm297_vm13, %v2424_v41, %v194_v44  ;;  %v195_v48 = vsel %vm193_vm12, %v2424_v41, %v194_v44 }
  0xf6   :  { %v303_v49 = vsel %vm296_vm15, %v299_v47, %v302_v45  ;;  %v199_v50 = vsel %vm192_vm14, %v195_v48, %v198_v46 }
  0xf7   :  { %v304_v51 = vsel %vm190_vm0, nan, %v303_v49  ;;  %v200_v52 = vsel %vm190_vm0, nan, %v199_v50 }
  0xf8   :  { %306 = vrot.lane.b32.xlu0 %v304_v51, %s2524_s27 }
 0x137   :  { %v745_v57 = vpop.permute.xlu1 %744 }
 0x138   :  { %v2689_v59 = vmul.f32 %v2627_v5, %v745_v57 }
 0x13a   :  { %v751_v60 = vand.u32 2139095040, %v2689_v59  ;;  %v748_v63 = vand.u32 2147483647, %v2689_v59  ;;  %vm750_vm11 = vcmp.lt.s32.totalorder %v2689_v59, 0 }
 0x13c   :  { %v752_v61 = vshrl.u32 %v751_v60, 23  ;;  %v755_v3 = vand.u32 8388607, %v748_v63  ;;  %vm749_vm12 = vcmp.le.f32.partialorder %v748_v63, 0.7853982 }
 0x13e   :  { %v2107_v62 = vadd.s32 4294967169, %v752_v61  ;;  %v756_v13 = vor.u32 8388608, %v755_v3 }
 0x140   :  { %v758_v0 = vadd.s32 1, %v2107_v62  ;;  %v796_v34 = vshll.u32 %v756_v13, 8 }
 0x142   :  { %vm759_vm3 = vcmp.gt.s32.totalorder %v758_v0, 0 }
 0x143   :  { %v760_v1 = vsel %vm759_vm3, %v758_v0, 0 }
 0x144   :  { %v762_v6 = vand.u32 31, %v760_v1  ;;  %v761_v8 = vshrl.u32 %v760_v1, 5 }
 0x146   :  { %v763_v10 = vsub.s32 32, %v762_v6  ;;  %v774_v11 = vshll.u32 %v2528_v19, %v762_v6  ;;  %v777_v12 = vshll.u32 %v2529_v21, %v762_v6  ;;  %v765_v14 = vshll.u32 %v2531_v27, %v762_v6 }
 0x147   :  { %v768_v15 = vshll.u32 %v2532_v29, %v762_v6  ;;  %v771_v16 = vshll.u32 %v2533_v32, %v762_v6  ;;  %vm783_vm4 = vcmp.lt.s32.totalorder %v761_v8, 4  ;;  %vm780_vm5 = vcmp.lt.s32.totalorder %v761_v8, 1 }
 0x148   :  { %v775_v17 = vshrl.u32 %v2529_v21, %v763_v10  ;;  %v778_v18 = vshrl.u32 %v2530_v25, %v763_v10  ;;  %v764_v20 = vshrl.u32 %v2531_v27, %v763_v10  ;;  %v766_v22 = vshrl.u32 %v2532_v29, %v763_v10 }
 0x149   :  { %v769_v23 = vshrl.u32 %v2533_v32, %v763_v10  ;;  %v772_v24 = vshrl.u32 %v2528_v19, %v763_v10  ;;  %vm782_vm6 = vcmp.lt.s32.totalorder %v761_v8, 3  ;;  %vm781_vm7 = vcmp.lt.s32.totalorder %v761_v8, 2 }
 0x14a   :  { %v776_v26 = vor.u32 %v775_v17, %v774_v11  ;;  %v779_v28 = vor.u32 %v778_v18, %v777_v12  ;;  %v767_v30 = vor.u32 %v766_v22, %v765_v14 }
 0x14b   :  { %v770_v31 = vor.u32 %v769_v23, %v768_v15  ;;  %v773_v33 = vor.u32 %v772_v24, %v771_v16 }
 0x14c   :  { %v789_v35 = vsel %vm783_vm4, %v776_v26, 920167782  ;;  %v793_v36 = vsel %vm783_vm4, %v779_v28, 1326507024  ;;  %v784_v37 = vsel %vm780_vm5, %v764_v20, %v767_v30 }
 0x14d   :  { %v785_v38 = vsel %vm783_vm4, %v773_v33, 2102212464  ;;  %v788_v39 = vsel %vm780_vm5, %v767_v30, %v770_v31  ;;  %v790_v9 = vsel %vm782_vm6, %v773_v33, %v789_v35  ;;  %v792_v40 = vsel %vm780_vm5, %v770_v31, %v773_v33 }
 0x14e   :  { %v786_v41 = vsel %vm782_vm6, %v770_v31, %v785_v38  ;;  %v791_v42 = vsel %vm781_vm7, %v788_v39, %v790_v9  ;;  %v794_v43 = vsel %vm782_vm6, %v776_v26, %v793_v36  ;;  %vm840_vm5 = vweird.f32 %v2689_v59 }
 0x14f   :  { %v787_v44 = vsel %vm781_vm7, %v784_v37, %v786_v41  ;;  %v795_v45 = vsel %vm781_vm7, %v792_v40, %v794_v43  ;;  %v2708_v46 = vmul.u32.u64.low %v796_v34, %v791_v42  ;;  %v2709_v47 = vmul.u32.u64.high %v796_v34, %v791_v42, %v2708_v46  ;;  %v2097_v42 = vld [vmem:[%s2965_s3] ss:$0 sm:$0xff] }
 0x150   :  { %v2711_v48 = vmul.u32.u64.low %v796_v34, %v795_v45  ;;  %v2712_v49 = vmul.u32.u64.high %v796_v34, %v795_v45, %v2711_v48  ;;  %v803_v50 = vmul.u32 %v796_v34, %v787_v44  ;;  %vm408_vm7 = vcmask 261120  }
 0x151   :  { %v806_v51 = vadd.s32 1, %v2709_v47  ;;  %v486_v48 = vld [vmem:[#allocation5 + $0x8] sm:$0xff] }
 0x152   :  { %vm805_vm8 = vc.u32 %v2712_v49, %v2708_v46  ;;  %v804_v62 = vadd.s32 %v2708_v46, %v2712_v49  ;;  %v485_v49 = vld [vmem:[#allocation5] sm:$0xff] }
 0x16a   :  { %v307_v53 = vpop.permute.xlu0 %306 }
 0x16b   :  { %v310_v54 = vsel %vm309_vm1, %v200_v52, %v307_v53  ;;  %v807_v52 = vsel %vm805_vm8, %v806_v51, %v2709_v47  ;;  %v487_v47 = vld [vmem:[#allocation5 + $0x10] sm:$0xff] }
 0x16c   :  { %2243 = vmatmul.mubr.msk.f32.vlgmr.msra.gmra.mxu0 %vm320_vm2, %v310_v54  ;;  %v808_v53 = vadd.s32 %v807_v52, %v803_v50  ;;  %v575_v50 = vld [vmem:[#allocation7 + $0x18] sm:$0xff]  ;;  %v2099_v51 = vld [vmem:[%s2967_s5] ss:$0 sm:$0xff] }
 0x16d   :  { %2264 = vmatprep.mubr.msk.f32.mxu0 %vm2534_vm9, %v2527_v4  ;;  %2257 = vmatpush3.msra.mxu0 %v488_v58 }
 0x16e   :  { %2258 = vmatprep.subr.mxu0 %v2527_v4  ;;  %v809_v54 = vadd.s32 536870912, %v808_v53 }
 0x16f   :  { %2259 = vmatpush3.msra.mxu0 %v487_v47 }
 0x170   :  { %v810_v7 = vshrl.u32 %v809_v54, 30  ;;  %2260 = vmatprep.subr.mxu0 %v2527_v4 }
 0x171   :  { %2261 = vmatpush3.msra.mxu0 %v486_v48 }
 0x172   :  { %v811_v55 = vshll.u32 %v810_v7, 30  ;;  %v834_v17 = vsub.s32 4, %v810_v7  ;;  %2262 = vmatprep.subr.mxu0 %v2527_v4 }
 0x173   :  { %2263 = vmatpush3.msra.mxu0 %v485_v49 }
 0x174   :  { %v812_v56 = vsub.s32 %v808_v53, %v811_v55  ;;  %v835_v22 = vsel %vm750_vm11, %v834_v17, %v810_v7  ;;  %2278 = vmatprep.subr.mxu0 %v2527_v4 }
 0x175   :  { %v837_v24 = vsel %vm749_vm12, 0, %v835_v22 }
 0x176   :  { %v814_v57 = vsub.s32 0, %v812_v56  ;;  %v944_v26 = vadd.s32 3, %v837_v24  ;;  %v841_v28 = vand.u32 3, %v837_v24 }
 0x178   :  { %v2108_v58 = vmin.u32 %v814_v57, %v812_v56  ;;  %v945_v30 = vand.u32 3, %v944_v26  ;;  %vm846_vm13 = vcmp.eq.s32.totalorder %v841_v28, 2  ;;  %vm843_vm15 = vcmp.eq.s32.totalorder %v841_v28, 0  ;;  %v573_v57 = vld [vmem:[#allocation7 + $0x8] sm:$0xff] }
 0x179   :  { %vm842_vm3 = vcmp.lt.s32.totalorder %v841_v28, 2 }
 0x17a   :  { %v816_v60 = vclz %v2108_v58  ;;  %vm950_vm14 = vcmp.eq.s32.totalorder %v945_v30, 2  ;;  %vm947_vm0 = vcmp.eq.s32.totalorder %v945_v30, 0  ;;  %vm946_vm4 = vcmp.lt.s32.totalorder %v945_v30, 2  ;;  %v572_v58 = vld [vmem:[#allocation7] sm:$0xff] }
 0x17c   :  { %v2109_v61 = vadd.s32 4294967294, %v816_v60  ;;  %v662_v60 = vld [vmem:[%s2972_s10 + $0x18] sm:$0xff] }
 0x17e   :  { %vm2110_vm10 = vcmp.lt.s32.totalorder %v2109_v61, 0 }
 0x17f   :  { %v819_v0 = vsel %vm2110_vm10, 0, %v2109_v61  ;;  %v2536_v61 = vmov 2  }
 0x180   :  { %v820_v1 = vsub.s32 32, %v819_v0  ;;  %v821_v3 = vshll.u32 %v812_v56, %v819_v0  ;;  %v824_v6 = vsub.s32 4294967266, %v819_v0  ;;  %v574_v56 = vld [vmem:[#allocation7 + $0x10] sm:$0xff]  ;;  %2422 = vset.pattern.permute.xlu0 %v2536_v61 }
 0x181   :  { %1401 = vperm.xlu0 %2422, %v2618_v2  }
 0x182   :  { %v822_v8 = vshrl.u32 %v804_v62, %v820_v1  ;;  %v825_v10 = vadd.s32 127, %v824_v6  ;;  %v2101_v62 = vld [vmem:[%s2969_s7] ss:$0 sm:$0xff] }
 0x184   :  { %v823_v11 = vor.u32 %v822_v8, %v821_v3  ;;  %v826_v12 = vshll.u32 %v825_v10, 23  ;;  %v962_v8 = vld [vmem:[#allocation2 + $0x18] sm:$0xff] }
 0x186   :  { %v827_v13 = vor.u32 4788187, %v826_v12  ;;  %v830_v14 = vcvt.s32.f32 %v823_v11  ;;  %v961_v12 = vld [vmem:[#allocation2 + $0x10] sm:$0xff] }
 0x188   :  { %v828_v15 = vand.u32 2147483647, %v827_v13  ;;  %v661_v13 = vld [vmem:[%s2972_s10 + $0x10] sm:$0xff] }
 0x18a   :  { %v831_v16 = vmul.f32 %v830_v14, %v828_v15  ;;  %v660_v14 = vld [vmem:[%s2972_s10 + $0x8] sm:$0xff]  ;;  %v659_v15 = vld [vmem:[%s2972_s10] sm:$0xff] }
 0x18c   :  { %v832_v18 = vxor.u32 2147483648, %v831_v16 }
 0x18e   :  { %v833_v20 = vsel %vm750_vm11, %v832_v18, %v831_v16 }
 0x18f   :  { %v836_v23 = vsel %vm749_vm12, %v2689_v59, %v833_v20 }
 0x190   :  { %2427 = vcosq.f32 %v836_v23 }
 0x191   :  { %2429 = vsinq.f32 %v836_v23 }
 0x19d   :  { %v2428_v31 = vpop.eup %2427 }
 0x19e   :  { %v2430_v33 = vpop.eup %2429  ;;  %v847_v34 = vxor.u32 2147483648, %v2428_v31 }
 0x19f   :  { %v844_v63 = vxor.u32 2147483648, %v2430_v33 }
 0x1a0   :  { %v952_v35 = vsel %vm950_vm14, %v847_v34, %v2430_v33  ;;  %v848_v36 = vsel %vm846_vm13, %v847_v34, %v2430_v33 }
 0x1a1   :  { %v949_v37 = vsel %vm947_vm0, %v2428_v31, %v844_v63  ;;  %v845_v38 = vsel %vm843_vm15, %v2428_v31, %v844_v63 }
 0x1a2   :  { %v953_v39 = vsel %vm946_vm4, %v949_v37, %v952_v35  ;;  %v849_v9 = vsel %vm842_vm3, %v845_v38, %v848_v36 }
 0x1a3   :  { %v954_v40 = vsel %vm840_vm5, nan, %v953_v39  ;;  %v2723_v41 = vsel %vm840_vm5, nan, %v849_v9 }
 0x1a4   :  { %956 = vrot.lane.b32.xlu1 %v954_v40, %s2524_s27 }
 0x1fc   :  { %v1402_v16 = vpop.permute.xlu0 %1401 }
 0x1fd   :  { %v2776_v17 = vmul.f32 %v2627_v5, %v1402_v16 }
 0x1ff   :  { %v1408_v18 = vand.u32 2139095040, %v2776_v17  ;;  %v1405_v23 = vand.u32 2147483647, %v2776_v17  ;;  %vm1407_vm4 = vcmp.lt.s32.totalorder %v2776_v17, 0 }
 0x201   :  { %v1409_v20 = vshrl.u32 %v1408_v18, 23  ;;  %v1412_v28 = vand.u32 8388607, %v1405_v23  ;;  %vm1406_vm5 = vcmp.le.f32.partialorder %v1405_v23, 0.7853982 }
 0x203   :  { %v2138_v22 = vadd.s32 4294967169, %v1409_v20  ;;  %v1413_v63 = vor.u32 8388608, %v1412_v28 }
 0x205   :  { %v1415_v24 = vadd.s32 1, %v2138_v22 }
 0x207   :  { %vm1416_vm11 = vcmp.gt.s32.totalorder %v1415_v24, 0 }
 0x208   :  { %v1417_v26 = vsel %vm1416_vm11, %v1415_v24, 0 }
 0x209   :  { %v1419_v30 = vand.u32 31, %v1417_v26  ;;  %v1418_v31 = vshrl.u32 %v1417_v26, 5 }
 0x20b   :  { %v1420_v33 = vsub.s32 32, %v1419_v30  ;;  %v1431_v34 = vshll.u32 %v2528_v19, %v1419_v30  ;;  %v1434_v5 = vshll.u32 %v2529_v21, %v1419_v30  ;;  %v1422_v35 = vshll.u32 %v2531_v27, %v1419_v30 }
 0x20c   :  { %v1425_v36 = vshll.u32 %v2532_v29, %v1419_v30  ;;  %v1428_v37 = vshll.u32 %v2533_v32, %v1419_v30  ;;  %vm1440_vm12 = vcmp.lt.s32.totalorder %v1418_v31, 4  ;;  %vm1437_vm13 = vcmp.lt.s32.totalorder %v1418_v31, 1 }
 0x20d   :  { %v1432_v38 = vshrl.u32 %v2529_v21, %v1420_v33  ;;  %v1435_v39 = vshrl.u32 %v2530_v25, %v1420_v33  ;;  %v1421_v9 = vshrl.u32 %v2531_v27, %v1420_v33  ;;  %v1423_v40 = vshrl.u32 %v2532_v29, %v1420_v33 }
 0x20e   :  { %vm1439_vm14 = vcmp.lt.s32.totalorder %v1418_v31, 3  ;;  %vm1438_vm15 = vcmp.lt.s32.totalorder %v1418_v31, 2  ;;  %v1453_v21 = vshll.u32 %v1413_v63, 8 }
 0x216   :  { %v957_v11 = vpop.permute.xlu1 %956 }
 0x217   :  { %v959_v2 = vsel %vm309_vm1, %v2723_v41, %v957_v11  ;;  %v1426_v41 = vshrl.u32 %v2533_v32, %v1420_v33 }
 0x22c   :  { %v390_v43 = vpop.f32.mrf.mxu0 }
 0x22d   :  { %v391_v44 = vadd.f32 %v2097_v42, %v390_v43  ;;  %v1429_v42 = vshrl.u32 %v2528_v19, %v1420_v33  ;;  %v1433_v43 = vor.u32 %v1432_v38, %v1431_v34 }
 0x22e   :  { %v2244_v45 = vpop.f32.mrf.mxu0 }
 0x22f   :  { %vm394_vm6 = vcmp.gt.f32.partialorder %v391_v44, 0.0  ;;  %v395_v59 = vmul.f32 0.2, %v391_v44  ;;  %v1424_v45 = vor.u32 %v1423_v40, %v1422_v35  ;;  %v1446_v47 = vsel %vm1440_vm12, %v1433_v43, 920167782 }
 0x231   :  { %v396_v46 = vsel %vm394_vm6, %v391_v44, %v395_v59  ;;  %v1436_v44 = vor.u32 %v1435_v39, %v1434_v5  ;;  %v1427_v59 = vor.u32 %v1426_v41, %v1425_v36  ;;  %v1441_v48 = vsel %vm1437_vm13, %v1421_v9, %v1424_v45 }
 0x232   :  { %2254 = vmatmul.mubr.msk.f32.vlgmr.msra.gmra.mxu1 %vm408_vm7, %v396_v46  ;;  %v1430_v46 = vor.u32 %v1429_v42, %v1428_v37 }
 0x233   :  { %2275 = vmatprep.mubr.msk.f32.mxu1 %vm2534_vm9, %v2527_v4  ;;  %2268 = vmatpush3.msra.mxu1 %v575_v50  ;;  %v1450_v25 = vsel %vm1440_vm12, %v1436_v44, 1326507024  ;;  %v1445_v49 = vsel %vm1437_vm13, %v1424_v45, %v1427_v59 }
 0x234   :  { %2269 = vmatprep.subr.mxu1 %v2527_v4  ;;  %v1442_v27 = vsel %vm1440_vm12, %v1430_v46, 2102212464  ;;  %v1447_v29 = vsel %vm1439_vm14, %v1430_v46, %v1446_v47  ;;  %v1449_v50 = vsel %vm1437_vm13, %v1427_v59, %v1430_v46  ;;  %v2103_v47 = vld [vmem:[%s2971_s9] ss:$0 sm:$0xff] }
 0x235   :  { %2270 = vmatpush3.msra.mxu1 %v574_v56  ;;  %v1448_v32 = vsel %vm1438_vm15, %v1445_v49, %v1447_v29 }
 0x236   :  { %2271 = vmatprep.subr.mxu1 %v2527_v4 }
 0x237   :  { %2272 = vmatpush3.msra.mxu1 %v573_v57 }
 0x238   :  { %2273 = vmatprep.subr.mxu1 %v2527_v4 }
 0x239   :  { %2274 = vmatpush3.msra.mxu1 %v572_v58 }
 0x23a   :  { %2289 = vmatprep.subr.mxu1 %v2527_v4 }
 0x2f2   :  { %v478_v52 = vpop.f32.mrf.mxu1 }
 0x2f3   :  { %v479_v53 = vadd.f32 %v2099_v51, %v478_v52  ;;  %v1443_v51 = vsel %vm1439_vm14, %v1427_v59, %v1442_v27  ;;  %v1451_v52 = vsel %vm1439_vm14, %v1433_v43, %v1450_v25  ;;  %vm1497_vm14 = vweird.f32 %v2776_v17 }
 0x2f4   :  { %v2255_v54 = vpop.f32.mrf.mxu1  ;;  %v1444_v19 = vsel %vm1438_vm15, %v1441_v48, %v1443_v51 }
 0x2f5   :  { %vm482_vm8 = vcmp.gt.f32.partialorder %v479_v53, 0.0  ;;  %v483_v7 = vmul.f32 0.2, %v479_v53  ;;  %v1460_v57 = vmul.u32 %v1453_v21, %v1444_v19  ;;  %v2120_v19 = vld [vmem:[%s2966_s4 + $0x30] sm:$0xff] }
 0x2f7   :  { %v484_v55 = vsel %vm482_vm8, %v479_v53, %v483_v7  ;;  %v1452_v53 = vsel %vm1438_vm15, %v1449_v50, %v1451_v52  ;;  %v2793_v54 = vmul.u32.u64.low %v1453_v21, %v1448_v32  ;;  %v2794_v7 = vmul.u32.u64.high %v1453_v21, %v1448_v32, %v2793_v54  ;;  %v2121_v50 = vld [vmem:[%s2966_s4 + $0x38] sm:$0xff] }
 0x2f8   :  { %2265 = vmatmul.mubr.msk.f32.vlgmr.msra.gmra.mxu0 %vm408_vm7, %v484_v55  ;;  %v2796_v55 = vmul.u32.u64.low %v1453_v21, %v1452_v53  ;;  %v2797_v56 = vmul.u32.u64.high %v1453_v21, %v1452_v53, %v2796_v55  ;;  %v2119_v53 = vld [vmem:[%s2966_s4 + $0x28] sm:$0xff] }
 0x2f9   :  { %2286 = vmatprep.mubr.msk.f32.mxu0 %vm2534_vm9, %v2527_v4  ;;  %2279 = vmatpush3.msra.mxu0 %v662_v60  ;;  %v1463_v58 = vadd.s32 1, %v2794_v7 }
 0x2fa   :  { %2280 = vmatprep.subr.mxu0 %v2527_v4  ;;  %vm1462_vm0 = vc.u32 %v2797_v56, %v2793_v54 }
 0x2fb   :  { %2281 = vmatpush3.msra.mxu0 %v661_v13  ;;  %v1464_v60 = vsel %vm1462_vm0, %v1463_v58, %v2794_v7  ;;  %v2118_v7 = vld [vmem:[%s2966_s4 + $0x20] sm:$0xff]  ;;  %v1138_v58 = vld [vmem:[#allocation5 + $0x28] sm:$0xff] }
 0x2fc   :  { %2282 = vmatprep.subr.mxu0 %v2527_v4  ;;  %v1465_v61 = vadd.s32 %v1464_v60, %v1460_v57  ;;  %v1139_v57 = vld [vmem:[#allocation5 + $0x30] sm:$0xff]  ;;  %v1137_v60 = vld [vmem:[#allocation5 + $0x20] sm:$0xff] }
 0x2fd   :  { %2283 = vmatpush3.msra.mxu0 %v660_v14 }
 0x2fe   :  { %2284 = vmatprep.subr.mxu0 %v2527_v4 }
 0x2ff   :  { %2285 = vmatpush3.msra.mxu0 %v659_v15 }
 0x300   :  { %2296 = vmatprep.subr.mxu0 %v2527_v4 }
 0x3b8   :  { %v565_v0 = vpop.f32.mrf.mxu0 }
 0x3b9   :  { %v566_v1 = vadd.f32 %v2101_v62, %v565_v0  ;;  %v1466_v62 = vadd.s32 536870912, %v1465_v61 }
 0x3ba   :  { %v2266_v3 = vpop.f32.mrf.mxu0 }
 0x3bb   :  { %vm569_vm10 = vcmp.gt.f32.partialorder %v566_v1, 0.0  ;;  %v570_v6 = vmul.f32 0.2, %v566_v1  ;;  %v1467_v0 = vshrl.u32 %v1466_v62, 30 }
 0x3bd   :  { %v571_v10 = vsel %vm569_vm10, %v566_v1, %v570_v6  ;;  %v1468_v1 = vshll.u32 %v1467_v0, 30  ;;  %v1491_v31 = vsub.s32 4, %v1467_v0 }
 0x3be   :  { %2276 = vmatmul.mubr.msk.f32.vlgmr.msra.gmra.mxu1 %vm408_vm7, %v571_v10 }
 0x3bf   :  { %2290 = vmatpush3.msra.mxu1 %v962_v8  ;;  %2293 = vmatprep.mubr.msk.f32.mxu1 %vm2534_vm9, %v2527_v4  ;;  %v1469_v3 = vsub.s32 %v1465_v61, %v1468_v1  ;;  %v1492_v5 = vsel %vm1407_vm4, %v1491_v31, %v1467_v0  ;;  %v1229_v61 = vld [vmem:[#allocation7 + $0x38] sm:$0xff]  ;;  %v2123_v1 = vld [vmem:[%s2967_s5 + $0x1] ss:$0 sm:$0xff] }
 0x3c0   :  { %2291 = vmatprep.subr.mxu1 %v2527_v4  ;;  %v1494_v35 = vsel %vm1406_vm5, 0, %v1492_v5  ;;  %v2131_v5 = vld [vmem:[%s2972_s10 + $0x20] sm:$0xff] }
 0x3c1   :  { %2292 = vmatpush3.msra.mxu1 %v961_v12  ;;  %v1471_v6 = vsub.s32 0, %v1469_v3  ;;  %v1461_v12 = vadd.s32 %v2793_v54, %v2797_v56  ;;  %v1601_v36 = vadd.s32 3, %v1494_v35  ;;  %v1498_v37 = vand.u32 3, %v1494_v35  ;;  %v1140_v56 = vld [vmem:[#allocation5 + $0x38] sm:$0xff] }
 0x3c2   :  { %2294 = vmatmul.mubr.msk.f32.vlgmr.msra.gmra.mxu1 %vm320_vm2, %v959_v2  ;;  %2307 = vmatprep.subr.mxu1 %v2527_v4 }
 0x3c3   :  { %2315 = vmatprep.mubr.msk.f32.mxu1 %vm2534_vm9, %v2527_v4  ;;  %v2139_v8 = vmin.u32 %v1471_v6, %v1469_v3  ;;  %v1602_v38 = vand.u32 3, %v1601_v36  ;;  %vm1503_vm6 = vcmp.eq.s32.totalorder %v1498_v37, 2  ;;  %vm1500_vm10 = vcmp.eq.s32.totalorder %v1498_v37, 0  ;;  %2308 = vmatpush3.msra.mxu1 %v1140_v56 }
 0x3c4   :  { %vm1499_vm12 = vcmp.lt.s32.totalorder %v1498_v37, 2  ;;  %2309 = vmatprep.subr.mxu1 %v2527_v4 }
 0x3c5   :  { %v1473_v10 = vclz %v2139_v8  ;;  %vm1607_vm8 = vcmp.eq.s32.totalorder %v1602_v38, 2  ;;  %vm1604_vm11 = vcmp.eq.s32.totalorder %v1602_v38, 0  ;;  %vm1603_vm13 = vcmp.lt.s32.totalorder %v1602_v38, 2  ;;  %2310 = vmatpush3.msra.mxu1 %v1139_v57  ;;  %v2147_v38 = vld [vmem:[%s2965_s3 + $0x2] ss:$0 sm:$0xff] }
 0x3c6   :  { %2311 = vmatprep.subr.mxu1 %v2527_v4  ;;  %v1885_v57 = vld [vmem:[#allocation7 + $0x50] sm:$0xff] }
 0x3c7   :  { %v2140_v11 = vadd.s32 4294967294, %v1473_v10  ;;  %2312 = vmatpush3.msra.mxu1 %v1138_v58  ;;  %v1884_v58 = vld [vmem:[#allocation7 + $0x48] sm:$0xff] }
 0x3c8   :  { %2313 = vmatprep.subr.mxu1 %v2527_v4 }
 0x3c9   :  { %vm2141_vm3 = vcmp.lt.s32.totalorder %v2140_v11, 0  ;;  %2314 = vmatpush3.msra.mxu1 %v1137_v60  ;;  %v1883_v60 = vld [vmem:[#allocation7 + $0x40] sm:$0xff] }
 0x3ca   :  { %v1476_v2 = vsel %vm2141_vm3, 0, %v2140_v11  ;;  %2329 = vmatprep.subr.mxu1 %v2527_v4 }
 0x3cb   :  { %v1477_v13 = vsub.s32 32, %v1476_v2  ;;  %v1478_v14 = vshll.u32 %v1469_v3, %v1476_v2  ;;  %v1481_v15 = vsub.s32 4294967266, %v1476_v2  ;;  %v1227_v2 = vld [vmem:[#allocation7 + $0x28] sm:$0xff] }
 0x3cd   :  { %v1479_v16 = vshrl.u32 %v1461_v12, %v1477_v13  ;;  %v1482_v18 = vadd.s32 127, %v1481_v15  ;;  %v1228_v12 = vld [vmem:[#allocation7 + $0x30] sm:$0xff]  ;;  %v1226_v13 = vld [vmem:[#allocation7 + $0x20] sm:$0xff] }
 0x3ce   :  { %v2126_v15 = vld [vmem:[%s2969_s7 + $0x1] ss:$0 sm:$0xff] }
 0x3cf   :  { %v1480_v20 = vor.u32 %v1479_v16, %v1478_v14  ;;  %v1483_v22 = vshll.u32 %v1482_v18, 23  ;;  %v2134_v14 = vld [vmem:[%s2972_s10 + $0x38] sm:$0xff] }
 0x3d1   :  { %v1484_v24 = vor.u32 4788187, %v1483_v22  ;;  %v1487_v26 = vcvt.s32.f32 %v1480_v20 }
 0x3d3   :  { %v1485_v28 = vand.u32 2147483647, %v1484_v24  ;;  %v1619_v24 = vld [vmem:[#allocation2 + $0x28] sm:$0xff] }
 0x3d5   :  { %v1488_v30 = vmul.f32 %v1487_v26, %v1485_v28 }
 0x3d7   :  { %v1489_v33 = vxor.u32 2147483648, %v1488_v30 }
 0x3d9   :  { %v1490_v34 = vsel %vm1407_vm4, %v1489_v33, %v1488_v30  ;;  %v1618_v30 = vld [vmem:[#allocation2 + $0x20] sm:$0xff]  ;;  %v2133_v33 = vld [vmem:[%s2972_s10 + $0x30] sm:$0xff] }
 0x3da   :  { %v1493_v63 = vsel %vm1406_vm5, %v2776_v17, %v1490_v34  ;;  %v2116_v17 = vld [vmem:[%s2965_s3 + $0x1] ss:$0 sm:$0xff]  ;;  %v2132_v34 = vld [vmem:[%s2972_s10 + $0x28] sm:$0xff] }
 0x3db   :  { %2431 = vcosq.f32 %v1493_v63 }
 0x3dc   :  { %2433 = vsinq.f32 %v1493_v63  ;;  %v2129_v63 = vld [vmem:[%s2971_s9 + $0x1] ss:$0 sm:$0xff] }
 0x3e8   :  { %v2432_v39 = vpop.eup %2431 }
 0x3e9   :  { %v2434_v9 = vpop.eup %2433  ;;  %v1504_v40 = vxor.u32 2147483648, %v2432_v39 }
 0x3ea   :  { %v1501_v23 = vxor.u32 2147483648, %v2434_v9 }
 0x3eb   :  { %v1609_v41 = vsel %vm1607_vm8, %v1504_v40, %v2434_v9  ;;  %v1505_v42 = vsel %vm1503_vm6, %v1504_v40, %v2434_v9  ;;  %v2152_v40 = vld [vmem:[%s2966_s4 + $0x58] sm:$0xff] }
 0x3ec   :  { %v1606_v43 = vsel %vm1604_vm11, %v2432_v39, %v1501_v23  ;;  %v1502_v44 = vsel %vm1500_vm10, %v2432_v39, %v1501_v23  ;;  %vm2070_vm10 = vcmask 57344  }
 0x3ed   :  { %v1610_v45 = vsel %vm1603_vm13, %v1606_v43, %v1609_v41  ;;  %v1506_v59 = vsel %vm1499_vm12, %v1502_v44, %v1505_v42  ;;  %v2151_v43 = vld [vmem:[%s2966_s4 + $0x50] sm:$0xff]  ;;  %v2150_v44 = vld [vmem:[%s2966_s4 + $0x48] sm:$0xff] }
 0x3ee   :  { %v1611_v46 = vsel %vm1497_vm14, nan, %v1610_v45  ;;  %v2808_v21 = vsel %vm1497_vm14, nan, %v1506_v59  ;;  %v2149_v59 = vld [vmem:[%s2966_s4 + $0x40] sm:$0xff] }
 0x3ef   :  { %1613 = vrot.lane.b32.xlu1 %v1611_v46, %s2524_s27 }
 0x461   :  { %v1614_v28 = vpop.permute.xlu1 %1613 }
 0x462   :  { %v1616_v31 = vsel %vm309_vm1, %v2808_v21, %v1614_v28  ;;  %v1797_v21 = vld [vmem:[#allocation5 + $0x58] sm:$0xff] }
 0x47e   :  { %v652_v25 = vpop.f32.mrf.mxu1 }
 0x47f   :  { %v653_v48 = vadd.f32 %v2103_v47, %v652_v25  ;;  %v1796_v47 = vld [vmem:[#allocation5 + $0x50] sm:$0xff]  ;;  %v1795_v25 = vld [vmem:[#allocation5 + $0x48] sm:$0xff] }
 0x480   :  { %v2277_v27 = vpop.f32.mrf.mxu1 }
 0x481   :  { %vm656_vm15 = vcmp.gt.f32.partialorder %v653_v48, 0.0  ;;  %v657_v49 = vmul.f32 0.2, %v653_v48  ;;  %v1886_v27 = vld [vmem:[#allocation7 + $0x58] sm:$0xff] }
 0x482   :  { %v1040_v29 = vpop.f32.mrf.mxu1 }
 0x483   :  { %v658_v51 = vsel %vm656_vm15, %v653_v48, %v657_v49  ;;  %v1041_v32 = vadd.f32 %v2116_v17, %v1040_v29  ;;  %v1794_v48 = vld [vmem:[#allocation5 + $0x40] sm:$0xff]  ;;  %v2105_v17 = vld [vmem:[%s2973_s11] ss:$0 sm:$0xff]  ;;  %v2136_v49 = vld [vmem:[%s2973_s11 + $0x1] ss:$0 sm:$0xff] }
 0x484   :  { %2287 = vmatmul.mubr.msk.f32.vlgmr.msra.gmra.mxu0 %vm408_vm7, %v658_v51  ;;  %v2295_v52 = vpop.f32.mrf.mxu1 }
 0x485   :  { %2297 = vmatpush3.msra.mxu0 %v2121_v50  ;;  %2304 = vmatprep.mubr.msk.f32.mxu0 %vm2534_vm9, %v2527_v4  ;;  %v1045_v54 = vmul.f32 0.2, %v1041_v32  ;;  %vm1044_vm0 = vcmp.gt.f32.partialorder %v1041_v32, 0.0 }
 0x486   :  { %2298 = vmatprep.subr.mxu0 %v2527_v4 }
 0x487   :  { %2299 = vmatpush3.msra.mxu0 %v2120_v19  ;;  %v1046_v55 = vsel %vm1044_vm0, %v1041_v32, %v1045_v54  ;;  %v2154_v19 = vld [vmem:[%s2967_s5 + $0x2] ss:$0 sm:$0xff] }
 0x488   :  { %2300 = vmatprep.subr.mxu0 %v2527_v4 }
 0x489   :  { %2301 = vmatpush3.msra.mxu0 %v2119_v53 }
 0x48a   :  { %2302 = vmatprep.subr.mxu0 %v2527_v4 }
 0x48b   :  { %2303 = vmatpush3.msra.mxu0 %v2118_v7 }
 0x48c   :  { %2305 = vmatmul.mubr.msk.f32.vlgmr.msra.gmra.mxu0 %vm408_vm7, %v1046_v55  ;;  %2318 = vmatprep.subr.mxu0 %v2527_v4 }
 0x48d   :  { %2326 = vmatprep.mubr.msk.f32.mxu0 %vm2534_vm9, %v2527_v4  ;;  %2319 = vmatpush3.msra.mxu0 %v1229_v61  ;;  %v2165_v61 = vld [vmem:[%s2972_s10 + $0x58] sm:$0xff] }
 0x48e   :  { %2320 = vmatprep.subr.mxu0 %v2527_v4 }
 0x48f   :  { %2321 = vmatpush3.msra.mxu0 %v1228_v12  ;;  %v2162_v12 = vld [vmem:[%s2972_s10 + $0x40] sm:$0xff] }
 0x490   :  { %2322 = vmatprep.subr.mxu0 %v2527_v4 }
 0x491   :  { %2323 = vmatpush3.msra.mxu0 %v1227_v2  ;;  %v2160_v2 = vld [vmem:[%s2971_s9 + $0x2] ss:$0 sm:$0xff]  ;;  %s2537_s9 = smov [#allocation8]  }
 0x492   :  { %2324 = vmatprep.subr.mxu0 %v2527_v4 }
 0x493   :  { %2325 = vmatpush3.msra.mxu0 %v1226_v13 }
 0x494   :  { %2340 = vmatprep.subr.mxu0 %v2527_v4 }
 0x544   :  { %v2844_v62 = vpop.f32.mrf.mxu0 }
 0x545   :  { %v740_v50 = vadd.f32 %v2105_v17, %v2844_v62  ;;  %v2157_v62 = vld [vmem:[%s2969_s7 + $0x2] ss:$0 sm:$0xff] }
 0x546   :  { %v2288_v0 = vpop.f32.mrf.mxu0 }
 0x54c   :  { %v1129_v3 = vpop.f32.mrf.mxu0 }
 0x54d   :  { %v1130_v6 = vadd.f32 %v2123_v1, %v1129_v3 }
 0x54e   :  { %v2306_v8 = vpop.f32.mrf.mxu0 }
 0x54f   :  { %vm1133_vm3 = vcmp.gt.f32.partialorder %v1130_v6, 0.0  ;;  %v1134_v10 = vmul.f32 0.2, %v1130_v6 }
 0x551   :  { %v1135_v11 = vsel %vm1133_vm3, %v1130_v6, %v1134_v10  ;;  %v2164_v10 = vld [vmem:[%s2972_s10 + $0x50] sm:$0xff] }
 0x552   :  { %2316 = vmatmul.mubr.msk.f32.vlgmr.msra.gmra.mxu1 %vm408_vm7, %v1135_v11  ;;  %v2163_v11 = vld [vmem:[%s2972_s10 + $0x48] sm:$0xff]  ;;  %s2078_s10 = sshll.u32 %s2537_s9, 4  ;;  %s2079_s10 = int_to_ptr.vmem [resolvable:$true] %s2078_s10 }
 0x553   :  { %2337 = vmatprep.mubr.msk.f32.mxu1 %vm2534_vm9, %v2527_v4  ;;  %2330 = vmatpush3.msra.mxu1 %v2134_v14  ;;  %s2495_s27 = scalar_lea.vmem %s2079_s10, 16  ;;  %p2500_p2 = scmp.lt.s32.totalorder %s2079_s10, %s2079_s10 }
 0x554   :  { %2331 = vmatprep.subr.mxu1 %v2527_v4  ;;  %p2496_p1 = scmp.ne.s32.totalorder %s2079_s10, %s2495_s27 }
 0x555   :  { %2332 = vmatpush3.msra.mxu1 %v2133_v33 }
 0x556   :  { %2333 = vmatprep.subr.mxu1 %v2527_v4 }
 0x557   :  { %2334 = vmatpush3.msra.mxu1 %v2132_v34 }
 0x558   :  { %2335 = vmatprep.subr.mxu1 %v2527_v4 }
 0x559   :  { %2336 = vmatpush3.msra.mxu1 %v2131_v5 }
 0x55a   :  { %2347 = vmatprep.subr.mxu1 %v2527_v4 }
 0x612   :  { %v1218_v16 = vpop.f32.mrf.mxu1 }
 0x613   :  { %v1219_v18 = vadd.f32 %v2126_v15, %v1218_v16 }
 0x614   :  { %v2317_v20 = vpop.f32.mrf.mxu1 }
 0x615   :  { %vm1222_vm4 = vcmp.gt.f32.partialorder %v1219_v18, 0.0  ;;  %v1223_v22 = vmul.f32 0.2, %v1219_v18 }
 0x617   :  { %v1224_v26 = vsel %vm1222_vm4, %v1219_v18, %v1223_v22 }
 0x618   :  { %2327 = vmatmul.mubr.msk.f32.vlgmr.msra.gmra.mxu0 %vm408_vm7, %v1224_v26 }
 0x619   :  { %2341 = vmatpush3.msra.mxu0 %v1619_v24  ;;  %2344 = vmatprep.mubr.msk.f32.mxu0 %vm2534_vm9, %v2527_v4 }
 0x61a   :  { %2342 = vmatprep.subr.mxu0 %v2527_v4 }
 0x61b   :  { %2343 = vmatpush3.msra.mxu0 %v1618_v30  ;;  %v2063_v30 = vlaneseq }
 0x61c   :  { %2345 = vmatmul.mubr.msk.f32.vlgmr.msra.gmra.mxu0 %vm320_vm2, %v1616_v31  ;;  %2358 = vmatprep.subr.mxu0 %v2527_v4 }
 0x61d   :  { %2366 = vmatprep.mubr.msk.f32.mxu0 %vm2534_vm9, %v2527_v4  ;;  %2359 = vmatpush3.msra.mxu0 %v1797_v21  ;;  %v2064_v31 = vand.u32 127, %v2063_v30  ;;  %v2066_v33 = vshrl.u32 %v2063_v30, 7 }
 0x61e   :  { %2360 = vmatprep.subr.mxu0 %v2527_v4 }
 0x61f   :  { %2361 = vmatpush3.msra.mxu0 %v1796_v47  ;;  %v2067_v34 = vsub.s32 %v2064_v31, %v2066_v33 }
 0x620   :  { %2362 = vmatprep.subr.mxu0 %v2527_v4 }
 0x621   :  { %2363 = vmatpush3.msra.mxu0 %v1795_v25 }
 0x622   :  { %2364 = vmatprep.subr.mxu0 %v2527_v4 }
 0x623   :  { %2365 = vmatpush3.msra.mxu0 %v1794_v48 }
 0x624   :  { %2380 = vmatprep.subr.mxu0 %v2527_v4 }
 0x6d8   :  { %v1307_v35 = vpop.f32.mrf.mxu0 }
 0x6d9   :  { %v1308_v36 = vadd.f32 %v2129_v63, %v1307_v35 }
 0x6da   :  { %v2328_v37 = vpop.f32.mrf.mxu0 }
 0x6db   :  { %vm1311_vm2 = vcmp.gt.f32.partialorder %v1308_v36, 0.0  ;;  %v1312_v39 = vmul.f32 0.2, %v1308_v36 }
 0x6dc   :  { %v1697_v9 = vpop.f32.mrf.mxu0 }
 0x6dd   :  { %v1313_v23 = vsel %vm1311_vm2, %v1308_v36, %v1312_v39  ;;  %v1698_v41 = vadd.f32 %v2147_v38, %v1697_v9 }
 0x6de   :  { %2338 = vmatmul.mubr.msk.f32.vlgmr.msra.gmra.mxu1 %vm408_vm7, %v1313_v23  ;;  %v2346_v42 = vpop.f32.mrf.mxu0 }
 0x6df   :  { %2348 = vmatpush3.msra.mxu1 %v2152_v40  ;;  %2355 = vmatprep.mubr.msk.f32.mxu1 %vm2534_vm9, %v2527_v4  ;;  %v1702_v45 = vmul.f32 0.2, %v1698_v41  ;;  %vm1701_vm5 = vcmp.gt.f32.partialorder %v1698_v41, 0.0 }
 0x6e0   :  { %2349 = vmatprep.subr.mxu1 %v2527_v4 }
 0x6e1   :  { %2350 = vmatpush3.msra.mxu1 %v2151_v43  ;;  %v1703_v46 = vsel %vm1701_vm5, %v1698_v41, %v1702_v45 }
 0x6e2   :  { %2351 = vmatprep.subr.mxu1 %v2527_v4 }
 0x6e3   :  { %2352 = vmatpush3.msra.mxu1 %v2150_v44 }
 0x6e4   :  { %2353 = vmatprep.subr.mxu1 %v2527_v4 }
 0x6e5   :  { %2354 = vmatpush3.msra.mxu1 %v2149_v59 }
 0x6e6   :  { %2356 = vmatmul.mubr.msk.f32.vlgmr.msra.gmra.mxu1 %vm408_vm7, %v1703_v46  ;;  %2369 = vmatprep.subr.mxu1 %v2527_v4 }
 0x6e7   :  { %2377 = vmatprep.mubr.msk.f32.mxu1 %vm2534_vm9, %v2527_v4  ;;  %2370 = vmatpush3.msra.mxu1 %v1886_v27 }
 0x6e8   :  { %2371 = vmatprep.subr.mxu1 %v2527_v4 }
 0x6e9   :  { %2372 = vmatpush3.msra.mxu1 %v1885_v57 }
 0x6ea   :  { %2373 = vmatprep.subr.mxu1 %v2527_v4 }
 0x6eb   :  { %2374 = vmatpush3.msra.mxu1 %v1884_v58 }
 0x6ec   :  { %2375 = vmatprep.subr.mxu1 %v2527_v4 }
 0x6ed   :  { %2376 = vmatpush3.msra.mxu1 %v1883_v60 }
 0x79e   :  { %v1396_v29 = vpop.f32.mrf.mxu1 }
 0x79f   :  { %v1397_v51 = vadd.f32 %v2136_v49, %v1396_v29 }
 0x7a0   :  { %v2339_v32 = vpop.f32.mrf.mxu1 }
 0x7a1   :  { %v2057_v52 = vmul.f32 %v1397_v51, %v740_v50 }
 0x7a6   :  { %v1786_v53 = vpop.f32.mrf.mxu1 }
 0x7a7   :  { %v1787_v54 = vadd.f32 %v2154_v19, %v1786_v53 }
 0x7a8   :  { %v2357_v7 = vpop.f32.mrf.mxu1 }
 0x7a9   :  { %vm1790_vm6 = vcmp.gt.f32.partialorder %v1787_v54, 0.0  ;;  %v1791_v55 = vmul.f32 0.2, %v1787_v54 }
 0x7ab   :  { %v1792_v56 = vsel %vm1790_vm6, %v1787_v54, %v1791_v55 }
 0x7ac   :  { %2367 = vmatmul.mubr.msk.f32.vlgmr.msra.gmra.mxu0 %vm408_vm7, %v1792_v56 }
 0x7ad   :  { %2388 = vmatprep.mubr.msk.f32.mxu0 %vm2534_vm9, %v2527_v4  ;;  %2381 = vmatpush3.msra.mxu0 %v2165_v61 }
 0x7ae   :  { %2382 = vmatprep.subr.mxu0 %v2527_v4 }
 0x7af   :  { %2383 = vmatpush3.msra.mxu0 %v2164_v10 }
 0x7b0   :  { %2384 = vmatprep.subr.mxu0 %v2527_v4 }
 0x7b1   :  { %2385 = vmatpush3.msra.mxu0 %v2163_v11 }
 0x7b2   :  { %2386 = vmatprep.subr.mxu0 %v2527_v4  ;;  %v2167_v4 = vld [vmem:[%s2973_s11 + $0x2] ss:$0 sm:$0xff]  ;;  %s2499_s11 = scalar_lea.vmem %s2079_s10, 32 }
 0x7b3   :  { %2387 = vmatpush3.msra.mxu0 %v2162_v12  ;;  %p2501_p3 = scmp.lt.s32.totalorder %s2499_s11, %s2495_s27 }
 0x7b5   :  { %p2502_p4 = por %p2501_p3, %p2500_p2 }
 0x7b7   :  { %p2503_p5 = pnand %p2502_p4, %p2496_p1 }
 0x86c   :  { %v1875_v0 = vpop.f32.mrf.mxu0 }
 0x86d   :  { %v1876_v1 = vadd.f32 %v2157_v62, %v1875_v0 }
 0x86e   :  { %v2368_v3 = vpop.f32.mrf.mxu0 }
 0x86f   :  { %vm1879_vm9 = vcmp.gt.f32.partialorder %v1876_v1, 0.0  ;;  %v1880_v6 = vmul.f32 0.2, %v1876_v1 }
 0x871   :  { %v1881_v8 = vsel %vm1879_vm9, %v1876_v1, %v1880_v6 }
 0x872   :  { %2378 = vmatmul.mubr.msk.f32.vlgmr.msra.gmra.mxu1 %vm408_vm7, %v1881_v8 }
 0x932   :  { %v1964_v13 = vpop.f32.mrf.mxu1 }
 0x933   :  { %v1965_v14 = vadd.f32 %v2160_v2, %v1964_v13 }
 0x934   :  { %v2379_v15 = vpop.f32.mrf.mxu1 }
 0x935   :  { %vm1968_vm8 = vcmp.gt.f32.partialorder %v1965_v14, 0.0  ;;  %v1969_v16 = vmul.f32 0.2, %v1965_v14 }
 0x937   :  { %v1970_v18 = vsel %vm1968_vm8, %v1965_v14, %v1969_v16 }
 0x938   :  { %2389 = vmatmul.mubr.msk.f32.vlgmr.msra.gmra.mxu0 %vm408_vm7, %v1970_v18 }
 0x9f8   :  { %v2053_v20 = vpop.f32.mrf.mxu0 }
 0x9f9   :  { %v2054_v22 = vadd.f32 %v2167_v4, %v2053_v20 }
 0x9fa   :  { %v2390_v24 = vpop.f32.mrf.mxu0 }
 0x9fb   :  { %v2058_v26 = vmul.f32 %v2057_v52, %v2054_v22 }
 0x9fd   :  { %v2059_v28 = vsel %vm309_vm1, %v2058_v26, 0.0 }
 0x9fe   :  { %2060 = vadd.xlane.f32.xlu1 %v2059_v28 }
 0xa87   :  { %v2061_v5 = vpop.xlane.xlu1 %2060 }
 0xa88   :  { %v2068_v63 = vrot.slane %v2061_v5, %v2067_v34 }
 0xa8a   :  { %2071 = vst.msk [vmem:[#allocation8] sm:$0x1] %vm2070_vm10, %v2068_v63 }
 0xa8b   :  { %2506 = shalt.err (!%p2503_p5)
}
 0xa8c   :  { %2081 = dma.vmem_to_hbm [thread:$0]  %s2079_s10, 16, %s2974_s12, [#allocation4]  }
 0xa8d   :  { %2519 = dma.done.wait [#allocation4], 16  }
 0xa8e   :  { %2520 = vsyncadd [#allocation4], 4294967280 }
 0xa8f   :  { %2085 = vsyncpa [#allocation3], 1 }
 0xa90   :  { %2086 = vsyncpa [#allocation6], 1 }
 0xa91   :  { %2087 = vsyncpa [#allocation4], 1 }

</bundles_post_ra>
